<compile_context>
chip_gen: v5e
topology: v5e:2x2
jax: 0.10.0
libtpu: 0.0.40
codegen_flags: <defaults>
</compile_context>

<pallas_src>
import math
import functools

import jax
import jax.numpy as jnp
from jax.experimental import pallas as pl
from jax.experimental.pallas import tpu as pltpu


def _round_up(x, m):
    return (x + m - 1) // m * m


def _pick_tile(dim, candidates):
    for c in candidates:
        if dim % c == 0:
            return c
    return candidates[-1]  # will pad (rare: tile candidates usually divide dim)


@functools.lru_cache(maxsize=None)
def _tpu_info():
    """Returns (generation, physical VMEM bytes per core), with safe fallbacks."""
    gen = 6
    try:
        kind = jax.devices()[0].device_kind.lower()
        for g in (7, 6, 5, 4):
            if f"v{g}" in kind:
                gen = g
                break
    except Exception:
        pass
    vmem = 64 * 1024 * 1024 if gen >= 7 else 128 * 1024 * 1024
    try:
        vmem = int(pltpu.get_tpu_info().vmem_capacity_bytes)
    except Exception:
        pass
    return gen, vmem


def _vmem_limit_bytes():
    _, vmem = _tpu_info()
    # Leave headroom for double buffering: ~3/4 of physical, capped at 100 MiB.
    return int(min(vmem * 3 // 4, 100 * 1024 * 1024))


def _mxu_rows():
    gen, _ = _tpu_info()
    return 256 if gen >= 6 else 128   # v6e/v7x: 2x256^2 MXU; v5e: 4x128^2


def _big_vmem():
    _, vmem = _tpu_info()
    return vmem >= 96 * 1024 * 1024


# ----------------------------------------------------------------------------- kernels

def _linear_kernel(*refs, nk, activation, has_bias, has_ln, eps):
    """Tiled matmul (bf16 operands, f32 accum) with optional bias/ReLU/residual+LN epilogue.

    Ref order: x, w, [b], [res, gamma, beta], out, [acc_scratch if nk > 1].
    Grid: (M_tiles, N_tiles, K_tiles); K is the last ("arbitrary") axis.
    """
    it = iter(refs)
    x_ref = next(it)
    w_ref = next(it)
    b_ref = next(it) if has_bias else None
    if has_ln:
        res_ref = next(it)
        g_ref = next(it)
        bt_ref = next(it)
    o_ref = next(it)
    acc_ref = next(it) if nk > 1 else None

    x = x_ref[...].astype(jnp.bfloat16)
    w = w_ref[...].astype(jnp.bfloat16)
    part = jnp.dot(x, w, preferred_element_type=jnp.float32)

    def epilogue(y):
        if has_bias:
            y = y + b_ref[...].astype(jnp.float32)
        if activation == "relu":
            y = jnp.maximum(y, 0.0)
        if has_ln:
            y = y + res_ref[...].astype(jnp.float32)
            mean = jnp.mean(y, axis=-1, keepdims=True)
            var = jnp.mean((y - mean) ** 2, axis=-1, keepdims=True)
            y = (y - mean) * jax.lax.rsqrt(var + eps)
            y = y * g_ref[...] + bt_ref[...]
        return y

    if nk == 1:
        # Single K tile: no accumulator scratch, no init/finalize.
        o_ref[...] = epilogue(part).astype(o_ref.dtype)
    else:
        k = pl.program_id(2)

        @pl.when(k == 0)
        def _init():
            acc_ref[...] = jnp.zeros_like(acc_ref)

        acc_ref[...] += part

        @pl.when(k == nk - 1)
        def _finalize():
            o_ref[...] = epilogue(acc_ref[...]).astype(o_ref.dtype)


def linear_fused(x2d, w, b=None, *, activation=None, residual=None,
                 gamma=None, beta=None, eps=1e-5):
    """(M, K) @ (K, N) with optional fused bias / ReLU / residual + LayerNorm."""
    M, K = x2d.shape
    N = w.shape[1]
    has_bias = b is not None
    has_ln = gamma is not None

    mxu = _mxu_rows()
    big = _big_vmem()

    # Row tile: full MXU height (256 on v6e/v7x, 128 on v5e); pad M up to the tile
    # rather than shrinking the tile to M.
    tm = min(mxu, _round_up(M, 8))
    Mp = _round_up(M, tm)

    # N tile: the LayerNorm epilogue needs the whole row resident; otherwise prefer
    # tile sizes that divide N so the weight table is never padded per call.
    if has_ln or N <= 2048:
        tn = N
    else:
        tn = _pick_tile(N, (512, 256, 128) if big else (256, 128))
    Np = _round_up(N, tn)

    # K tile (accumulator only when the contraction is large).
    if K <= 2048:
        tk = K
    else:
        tk = _pick_tile(K, (1024, 512, 256) if big else (512, 256))
    Kp = _round_up(K, tk)
    nk = Kp // tk

    xp, wp_, bp_, rp = x2d, w, b, residual
    if Mp > M:
        xp = jnp.pad(xp, ((0, Mp - M), (0, 0)))
        if rp is not None:
            rp = jnp.pad(rp, ((0, Mp - M), (0, 0)))
    if Kp > K:
        xp = jnp.pad(xp, ((0, 0), (0, Kp - K)))
        wp_ = jnp.pad(wp_, ((0, Kp - K), (0, 0)))
    if Np > N:
        wp_ = jnp.pad(wp_, ((0, 0), (0, Np - N)))
        if bp_ is not None:
            bp_ = jnp.pad(bp_, ((0, 0), (0, Np - N)))

    in_specs = [pl.BlockSpec((tm, tk), lambda i, j, k: (i, k)),
                pl.BlockSpec((tk, tn), lambda i, j, k: (k, j))]
    args = [xp, wp_]
    # TODO(synk): pipeline_mode=pl.Buffered(1) on these grid-invariant blocks would
    #             reclaim their second pipeline buffer (matters most on v7x).
    if has_bias:
        in_specs.append(pl.BlockSpec((1, tn), lambda i, j, k: (0, j)))
        args.append(bp_)
    if has_ln:
        in_specs.append(pl.BlockSpec((tm, tn), lambda i, j, k: (i, j)))
        args.append(rp)
        in_specs.append(pl.BlockSpec((1, tn), lambda i, j, k: (0, j)))
        args.append(gamma)
        in_specs.append(pl.BlockSpec((1, tn), lambda i, j, k: (0, j)))
        args.append(beta)

    scratch = [pltpu.VMEM((tm, tn), jnp.float32)] if nk > 1 else []

    out = pl.pallas_call(
        functools.partial(_linear_kernel, nk=nk, activation=activation,
                          has_bias=has_bias, has_ln=has_ln, eps=eps),
        out_shape=jax.ShapeDtypeStruct((Mp, Np), x2d.dtype),
        grid=(Mp // tm, Np // tn, nk),
        in_specs=in_specs,
        out_specs=pl.BlockSpec((tm, tn), lambda i, j, k: (i, j)),
        scratch_shapes=scratch,
        compiler_params=pltpu.CompilerParams(
            dimension_semantics=("parallel", "parallel", "arbitrary"),
            vmem_limit_bytes=_vmem_limit_bytes()),
    )(*args)

    if Mp > M or Np > N:
        out = out[:M, :N]
    return out


def _ffn_kernel(x_ref, w1_ref, b1_ref, w2_ref, b2_ref, res_ref, g_ref, bt_ref, o_ref, *, eps):
    """LayerNorm(residual + (ReLU(x@w1+b1))@w2 + b2); the (tm, d_ff) hidden stays in VMEM."""
    x = x_ref[...].astype(jnp.bfloat16)
    h = jnp.dot(x, w1_ref[...].astype(jnp.bfloat16),
                preferred_element_type=jnp.float32) + b1_ref[...]
    h = jnp.maximum(h, 0.0)
    y = jnp.dot(h.astype(jnp.bfloat16), w2_ref[...].astype(jnp.bfloat16),
                preferred_element_type=jnp.float32) + b2_ref[...]
    y = y + res_ref[...].astype(jnp.float32)
    mean = jnp.mean(y, axis=-1, keepdims=True)
    var = jnp.mean((y - mean) ** 2, axis=-1, keepdims=True)
    y = (y - mean) * jax.lax.rsqrt(var + eps)
    y = y * g_ref[...] + bt_ref[...]
    o_ref[...] = y.astype(o_ref.dtype)


def ffn_fused(x2d, w1, b1, w2, b2, residual, gamma, beta, eps=1e-5):
    M, E = x2d.shape
    F = w1.shape[1]

    tm = min(_mxu_rows(), _round_up(M, 8))

    # VMEM needed by the fully-resident single-kernel path.  The pipeline
    # double-buffers every input (weights included), and the (tm, F) f32 hidden plus
    # the x / residual / output tiles sit on top.  If that exceeds the derived
    # per-generation budget, fall back to two tiled matmuls (LayerNorm still fused
    # into the second one).
    resident = 2 * 4 * (E * F + F * E + F + 3 * E)        # dbl-buffered weights/bias/ln
    resident += 2 * 4 * 2 * tm * E                        # x + residual tiles (2 bufs)
    resident += 4 * tm * F + 2 * 4 * tm * E               # f32 hidden + output tiles
    if resident > int(_vmem_limit_bytes() * 0.8):
        h = linear_fused(x2d, w1, b1, activation="relu")
        return linear_fused(h, w2, b2, residual=residual, gamma=gamma, beta=beta, eps=eps)

    Mp = _round_up(M, tm)
    xp, rp = x2d, residual
    if Mp > M:
        xp = jnp.pad(xp, ((0, Mp - M), (0, 0)))
        rp = jnp.pad(rp, ((0, Mp - M), (0, 0)))

    out = pl.pallas_call(
        functools.partial(_ffn_kernel, eps=eps),
        out_shape=jax.ShapeDtypeStruct((Mp, E), x2d.dtype),
        grid=(Mp // tm,),
        in_specs=[
            pl.BlockSpec((tm, E), lambda i: (i, 0)),
            pl.BlockSpec((E, F), lambda i: (0, 0)),
            pl.BlockSpec((1, F), lambda i: (0, 0)),
            pl.BlockSpec((F, E), lambda i: (0, 0)),
            pl.BlockSpec((1, E), lambda i: (0, 0)),
            pl.BlockSpec((tm, E), lambda i: (i, 0)),
            pl.BlockSpec((1, E), lambda i: (0, 0)),
            pl.BlockSpec((1, E), lambda i: (0, 0)),
        ],
        out_specs=pl.BlockSpec((tm, E), lambda i: (i, 0)),
        compiler_params=pltpu.CompilerParams(
            dimension_semantics=("parallel",),
            vmem_limit_bytes=_vmem_limit_bytes()),
    )(xp, w1, b1, w2, b2, rp, gamma, beta)
    return out[:M] if Mp > M else out


def _flash_attn_kernel(q_ref, k_ref, v_ref, o_ref, m_sc, l_sc, acc_sc, *,
                       scale, causal, tq, tkv, skv_valid, nkv):
    """Flash-style attention for one (batch, head, q-tile) block over KV tiles."""
    qi = pl.program_id(2)
    ki = pl.program_id(3)

    @pl.when(ki == 0)
    def _init():
        m_sc[...] = jnp.full(m_sc.shape, -1e30, m_sc.dtype)
        l_sc[...] = jnp.zeros_like(l_sc)
        acc_sc[...] = jnp.zeros_like(acc_sc)

    q_start = qi * tq
    k_start = ki * tkv

    def _step():
        # Scale q before QK^T (O(Sq*Hd) instead of O(Sq*Skv) VPU work).
        q = (q_ref[0, 0, 0] * scale).astype(jnp.bfloat16)            # (tq, Hd)
        k = k_ref[0, 0, 0].astype(jnp.bfloat16)                      # (tkv, Hd)
        s = jax.lax.dot_general(q, k, (((1,), (1,)), ((), ())),
                                preferred_element_type=jnp.float32)  # (tq, tkv)
        col = k_start + jax.lax.broadcasted_iota(jnp.int32, (tq, tkv), 1)
        keep = col < skv_valid                                       # padded-KV mask
        if causal:
            row = q_start + jax.lax.broadcasted_iota(jnp.int32, (tq, tkv), 0)
            keep = jnp.logical_and(keep, col <= row)
        s = jnp.where(keep, s, -1e30)                                # finite fill: no inf-inf NaN
        m_prev = m_sc[...]
        m_new = jnp.maximum(m_prev, jnp.max(s, axis=-1, keepdims=True))
        alpha = jnp.exp(m_prev - m_new)
        p = jnp.exp(s - m_new)
        l_sc[...] = alpha * l_sc[...] + jnp.sum(p, axis=-1, keepdims=True)
        acc_sc[...] = alpha * acc_sc[...] + jnp.dot(
            p.astype(jnp.bfloat16), v_ref[0, 0, 0].astype(jnp.bfloat16),
            preferred_element_type=jnp.float32)
        m_sc[...] = m_new

    if causal:
        # Skip KV tiles that are entirely in the future of this Q tile.
        @pl.when(k_start <= q_start + tq - 1)
        def _masked_step():
            _step()
    else:
        _step()

    @pl.when(ki == nkv - 1)
    def _finalize():
        # Reciprocal applied to the (tq, Hd) output, not the (tq, tkv) probabilities.
        o_ref[0, 0] = (acc_sc[...] * pl.reciprocal(l_sc[...], approx=True)
                       ).astype(o_ref.dtype)


def _pad_seq(arr, new_len):
    if arr.shape[3] == new_len:
        return arr
    pad = [(0, 0)] * arr.ndim
    pad[3] = (0, new_len - arr.shape[3])
    return jnp.pad(arr, pad)


def mha_attention(q_pack, k_pack, v_pack, q_slab, k_slab, v_slab, *, causal):
    """Multi-head attention on packed per-head arrays.

    q_pack / k_pack / v_pack: (n_slabs, B, H, S, Hd); q_slab/k_slab/v_slab pick the
    slab along axis 0 (so the fused QKV / KV projection output is consumed directly,
    no strided HBM slices).  Returns (B, H, Sq, Hd).
    """
    _, B, H, Sq, Hd = q_pack.shape
    Skv = k_pack.shape[3]
    scale = 1.0 / math.sqrt(Hd)
    big = _big_vmem()

    tq = min(256, _round_up(Sq, 8))
    tkv = min(512 if big else 256, _round_up(Skv, 8))
    Sq_p = _round_up(Sq, tq)
    Skv_p = _round_up(Skv, tkv)
    nq, nkv = Sq_p // tq, Skv_p // tkv

    q_pad = _pad_seq(q_pack, Sq_p)
    if k_pack is q_pack and Skv_p == Sq_p:
        k_pad = q_pad
    else:
        k_pad = _pad_seq(k_pack, Skv_p)
    if v_pack is k_pack:
        v_pad = k_pad
    elif v_pack is q_pack and Skv_p == Sq_p:
        v_pad = q_pad
    else:
        v_pad = _pad_seq(v_pack, Skv_p)

    out = pl.pallas_call(
        functools.partial(_flash_attn_kernel, scale=scale, causal=causal,
                          tq=tq, tkv=tkv, skv_valid=Skv, nkv=nkv),
        out_shape=jax.ShapeDtypeStruct((B, H, Sq_p, Hd), q_pack.dtype),
        grid=(B, H, nq, nkv),
        in_specs=[
            pl.BlockSpec((1, 1, 1, tq, Hd), lambda b, h, q, k: (q_slab, b, h, q, 0)),
            pl.BlockSpec((1, 1, 1, tkv, Hd), lambda b, h, q, k: (k_slab, b, h, k, 0)),
            pl.BlockSpec((1, 1, 1, tkv, Hd), lambda b, h, q, k: (v_slab, b, h, k, 0)),
        ],
        out_specs=pl.BlockSpec((1, 1, tq, Hd), lambda b, h, q, k: (b, h, q, 0)),
        scratch_shapes=[pltpu.VMEM((tq, 1), jnp.float32),
                        pltpu.VMEM((tq, 1), jnp.float32),
                        pltpu.VMEM((tq, Hd), jnp.float32)],
        compiler_params=pltpu.CompilerParams(
            dimension_semantics=("parallel", "parallel", "parallel", "arbitrary"),
            vmem_limit_bytes=_vmem_limit_bytes()),
    )(q_pad, k_pad, v_pad)

    if Sq_p > Sq:
        out = out[:, :, :Sq]
    return out


# ------------------------------------------------------------------------ model pieces

def positional_encoding(seq_len, embed_size):
    pos = jnp.arange(seq_len, dtype=jnp.float32)[:, None]
    i2 = jnp.arange(0, embed_size, 2, dtype=jnp.float32)
    div = jnp.exp(-math.log(10000.0) * i2 / embed_size)
    pe = jnp.zeros((seq_len, embed_size), jnp.float32)
    pe = pe.at[:, ::2].set(jnp.sin(pos * div))
    pe = pe.at[:, 1::2].set(jnp.cos(pos * div))
    return pe


def encoder_layer(x, p, n_heads):
    B, S, E = x.shape
    Hd = E // n_heads
    x2d = x.reshape(B * S, E)

    # Fused QKV projection; one transpose to per-head layout, then the attention
    # BlockSpecs pick the q/k/v slabs directly from the packed array.
    qkv = linear_fused(x2d, p["mha"]["wqkv"], p["mha"]["bqkv"])             # (BS, 3E)
    qkv5 = qkv.reshape(B, S, 3, n_heads, Hd).transpose(2, 0, 3, 1, 4)       # (3,B,H,S,Hd)
    a = mha_attention(qkv5, qkv5, qkv5, 0, 1, 2, causal=False)              # (B,H,S,Hd)
    a2d = a.transpose(0, 2, 1, 3).reshape(B * S, E)

    # Output projection with fused residual-add + LayerNorm epilogue.
    x1 = linear_fused(a2d, p["mha"]["wp"], p["mha"]["bp"],
                      residual=x2d, gamma=p["ln1_g"], beta=p["ln1_b"])

    # FFN + residual + LayerNorm in one kernel.
    x2 = ffn_fused(x1, p["ff_w1"], p["ff_b1"], p["ff_w2"], p["ff_b2"],
                   residual=x1, gamma=p["ln2_g"], beta=p["ln2_b"])
    return x2.reshape(B, S, E)


def decoder_layer(x, memory, p, n_heads):
    B, St, E = x.shape
    Ss = memory.shape[1]
    Hd = E // n_heads
    x2d = x.reshape(B * St, E)
    mem2d = memory.reshape(B * Ss, E)

    # Masked (causal) self-attention.
    qkv = linear_fused(x2d, p["mmha"]["wqkv"], p["mmha"]["bqkv"])
    qkv5 = qkv.reshape(B, St, 3, n_heads, Hd).transpose(2, 0, 3, 1, 4)
    a = mha_attention(qkv5, qkv5, qkv5, 0, 1, 2, causal=True)
    x1 = linear_fused(a.transpose(0, 2, 1, 3).reshape(B * St, E),
                      p["mmha"]["wp"], p["mmha"]["bp"],
                      residual=x2d, gamma=p["ln1_g"], beta=p["ln1_b"])

    # Cross-attention over encoder memory (fused K|V projection).
    q = linear_fused(x1, p["mha"]["wq"], p["mha"]["bq"])                    # (B*St, E)
    q5 = q.reshape(B, St, n_heads, Hd).transpose(0, 2, 1, 3)[None]          # (1,B,H,St,Hd)
    kv = linear_fused(mem2d, p["mha"]["wkv"], p["mha"]["bkv"])              # (B*Ss, 2E)
    kv5 = kv.reshape(B, Ss, 2, n_heads, Hd).transpose(2, 0, 3, 1, 4)        # (2,B,H,Ss,Hd)
    c = mha_attention(q5, kv5, kv5, 0, 0, 1, causal=False)
    x2 = linear_fused(c.transpose(0, 2, 1, 3).reshape(B * St, E),
                      p["mha"]["wp"], p["mha"]["bp"],
                      residual=x1, gamma=p["ln2_g"], beta=p["ln2_b"])

    # FFN + residual + LayerNorm.
    x3 = ffn_fused(x2, p["ff_w1"], p["ff_b1"], p["ff_w2"], p["ff_b2"],
                   residual=x2, gamma=p["ln3_g"], beta=p["ln3_b"])
    return x3.reshape(B, St, E)


def transformer_forward(params, src, tgt, cfg):
    """src: (B, S_src) int32, tgt: (B, S_tgt) int32 -> logits (B, S_tgt, vocab)."""
    E = cfg["embed_size"]
    H = cfg["n_heads"]
    sqrt_d = math.sqrt(E)
    emb = params["emb"]                     # (vocab, E), tied with fc weight
    pe = params["pos_enc"]

    B, Ss = src.shape
    _, St = tgt.shape

    # ---- encode (dropout = identity in eval mode)
    # TODO(synk): embedding gather kept at XLA level (a scalar-prefetch Pallas gather is
    #             not worth it at these sizes).
    x = emb[src] * sqrt_d + pe[:Ss]
    for lp in params["encoder"]:
        x = encoder_layer(x, lp, H)
    memory = x

    # ---- decode
    y = emb[tgt] * sqrt_d + pe[:St]
    for lp in params["decoder"]:
        y = decoder_layer(y, memory, lp, H)

    # ---- final projection, tied weights: the transposed (and tile-padded) table was
    #      materialized once at parameter setup, so this is a plain tiled matmul.
    logits = linear_fused(y.reshape(B * St, E), params["emb_t"], params["fc_b"])
    logits = logits[:, :cfg["vocab_size"]]
    return logits.reshape(B, St, cfg["vocab_size"])


# --------------------------------------------------------------------- parameter setup

def _lin_params(key, d_in, d_out):
    kw, kb = jax.random.split(key)
    bound = 1.0 / math.sqrt(d_in)
    w = jax.random.uniform(kw, (d_in, d_out), jnp.float32, -bound, bound)
    b = jax.random.uniform(kb, (1, d_out), jnp.float32, -bound, bound)
    return w, b


def _self_mha_params(key, E):
    ks = jax.random.split(key, 4)
    wq, bq = _lin_params(ks[0], E, E)
    wk, bk = _lin_params(ks[1], E, E)
    wv, bv = _lin_params(ks[2], E, E)
    wp, bp = _lin_params(ks[3], E, E)
    return dict(wqkv=jnp.concatenate([wq, wk, wv], axis=1),
                bqkv=jnp.concatenate([bq, bk, bv], axis=1),
                wp=wp, bp=bp)


def _cross_mha_params(key, E):
    ks = jax.random.split(key, 4)
    wq, bq = _lin_params(ks[0], E, E)
    wk, bk = _lin_params(ks[1], E, E)
    wv, bv = _lin_params(ks[2], E, E)
    wp, bp = _lin_params(ks[3], E, E)
    return dict(wq=wq, bq=bq,
                wkv=jnp.concatenate([wk, wv], axis=1),
                bkv=jnp.concatenate([bk, bv], axis=1),
                wp=wp, bp=bp)


def _ln_params(E):
    return jnp.ones((1, E), jnp.float32), jnp.zeros((1, E), jnp.float32)


def init_params(key, cfg):
    E, d_ff = cfg["embed_size"], cfg["d_ff"]
    keys = jax.random.split(key, 4)

    enc_layers = []
    for k in jax.random.split(keys[0], cfg["n_encoder_layers"]):
        k1, k2, k3 = jax.random.split(k, 3)
        w1, b1 = _lin_params(k2, E, d_ff)
        w2, b2 = _lin_params(k3, d_ff, E)
        g1, bb1 = _ln_params(E)
        g2, bb2 = _ln_params(E)
        enc_layers.append(dict(mha=_self_mha_params(k1, E),
                               ff_w1=w1, ff_b1=b1, ff_w2=w2, ff_b2=b2,
                               ln1_g=g1, ln1_b=bb1, ln2_g=g2, ln2_b=bb2))

    dec_layers = []
    for k in jax.random.split(keys[1], cfg["n_decoder_layers"]):
        k1, k2, k3, k4 = jax.random.split(k, 4)
        w1, b1 = _lin_params(k3, E, d_ff)
        w2, b2 = _lin_params(k4, d_ff, E)
        g1, bb1 = _ln_params(E)
        g2, bb2 = _ln_params(E)
        g3, bb3 = _ln_params(E)
        dec_layers.append(dict(mmha=_self_mha_params(k1, E), mha=_cross_mha_params(k2, E),
                               ff_w1=w1, ff_b1=b1, ff_w2=w2, ff_b2=b2,
                               ln1_g=g1, ln1_b=bb1, ln2_g=g2, ln2_b=bb2,
                               ln3_g=g3, ln3_b=bb3))

    emb = jax.random.normal(keys[2], (cfg["vocab_size"], E), jnp.float32) * 0.02

    # Tied output projection: transpose (and pad the vocab axis to the projection tile)
    # once at setup so no per-forward emb.T / jnp.pad HBM copies are needed.
    V = cfg["vocab_size"]
    Vp = _round_up(V, 512) if V > 2048 else V
    emb_t = emb.T
    if Vp > V:
        emb_t = jnp.pad(emb_t, ((0, 0), (0, Vp - V)))
    fc_b = jnp.zeros((1, Vp), jnp.float32)

    return dict(emb=emb, emb_t=emb_t, fc_b=fc_b,
                pos_enc=positional_encoding(cfg["max_len"], E),
                encoder=enc_layers, decoder=dec_layers)


# --------------------------------------------------------------------------------- main

if __name__ == "__main__":
    cfg = dict(vocab_size=64, n_encoder_layers=2, n_decoder_layers=2,
               n_heads=2, embed_size=32, d_ff=64, max_len=32)

    key = jax.random.PRNGKey(0)
    kp, ks, kt = jax.random.split(key, 3)

    params = init_params(kp, cfg)

    B, S_src, S_tgt = 2, 8, 8
    src = jax.random.randint(ks, (B, S_src), 0, cfg["vocab_size"], dtype=jnp.int32)
    tgt = jax.random.randint(kt, (B, S_tgt), 0, cfg["vocab_size"], dtype=jnp.int32)

    fwd = jax.jit(functools.partial(transformer_forward, cfg=cfg))
    logits = jax.block_until_ready(fwd(params, src, tgt))

    assert logits.shape == (B, S_tgt, cfg["vocab_size"])
    assert bool(jnp.all(jnp.isfinite(logits)))
    print("KERNEL_OK")
</pallas_src>

<mosaic_0001>
module attributes {stable_mosaic.version = 11 : i64} {
  func.func @_linear_kernel(%arg0: i32, %arg1: i32, %arg2: i32, %arg3: memref<16x32xf32, #tpu.memory_space<vmem>>, %arg4: memref<32x96xf32, #tpu.memory_space<vmem>>, %arg5: memref<1x96xf32, #tpu.memory_space<vmem>>, %arg6: memref<16x96xf32, #tpu.memory_space<vmem>>) attributes {dimension_semantics = [#tpu.dimension_semantics<parallel>, #tpu.dimension_semantics<parallel>, #tpu.dimension_semantics<arbitrary>], iteration_bounds = array<i64: 1, 1, 1>, scalar_prefetch = 0 : i64, scratch_operands = 0 : i64, tpu.core_type = #tpu.core_type<tc>, window_params = [{transform_indices = @transform_0, window_bounds = array<i64: 16, 32>}, {transform_indices = @transform_1, window_bounds = array<i64: 32, 96>}, {transform_indices = @transform_2, window_bounds = array<i64: 1, 96>}, {transform_indices = @transform_3, window_bounds = array<i64: 16, 96>}]} {
    %c0 = arith.constant 0 : index
    %c0_0 = arith.constant 0 : index
    %0 = vector.load %arg3[%c0, %c0_0] : memref<16x32xf32, #tpu.memory_space<vmem>>, vector<16x32xf32>
    %1 = arith.truncf %0 : vector<16x32xf32> to vector<16x32xbf16>
    %c0_1 = arith.constant 0 : index
    %c0_2 = arith.constant 0 : index
    %2 = vector.load %arg4[%c0_1, %c0_2] : memref<32x96xf32, #tpu.memory_space<vmem>>, vector<32x96xf32>
    %3 = arith.truncf %2 : vector<32x96xf32> to vector<32x96xbf16>
    %cst = arith.constant dense<0.000000e+00> : vector<16x96xf32>
    %4 = tpu.matmul %1, %3, %cst {dimension_numbers = #tpu.dot_dimension_numbers<[1], [0], [0], [1], [0, 0, 1, 1], [], []>} : vector<16x32xbf16>, vector<32x96xbf16>, vector<16x96xf32> -> vector<16x96xf32>
    %c0_3 = arith.constant 0 : index
    %c0_4 = arith.constant 0 : index
    %5 = vector.load %arg5[%c0_3, %c0_4] : memref<1x96xf32, #tpu.memory_space<vmem>>, vector<1x96xf32>
    %6 = vector.broadcast %5 : vector<1x96xf32> to vector<16x96xf32>
    %7 = arith.addf %4, %6 : vector<16x96xf32>
    %c0_5 = arith.constant 0 : index
    %c0_6 = arith.constant 0 : index
    %8 = vector.load %arg6[%c0_5, %c0_6] : memref<16x96xf32, #tpu.memory_space<vmem>>, vector<16x96xf32>
    tpu.vector_store %arg6[%c0_5, %c0_6], %7 {strides = array<i32>} : memref<16x96xf32, #tpu.memory_space<vmem>>, vector<16x96xf32>,
    return
  }
  func.func @transform_0(%arg0: i32, %arg1: i32, %arg2: i32) -> (i32, i32) {
    %c0_i32 = arith.constant 0 : i32
    return %arg0, %arg2 : i32, i32
  }
  func.func @transform_1(%arg0: i32, %arg1: i32, %arg2: i32) -> (i32, i32) {
    %c0_i32 = arith.constant 0 : i32
    return %arg2, %arg1 : i32, i32
  }
  func.func @transform_2(%arg0: i32, %arg1: i32, %arg2: i32) -> (i32, i32) {
    %c0_i32 = arith.constant 0 : i32
    %c0_i32_0 = arith.constant 0 : i32
    return %c0_i32, %arg1 : i32, i32
  }
  func.func @transform_3(%arg0: i32, %arg1: i32, %arg2: i32) -> (i32, i32) {
    %c0_i32 = arith.constant 0 : i32
    return %arg0, %arg1 : i32, i32
  }
}

module attributes {stable_mosaic.version = 11 : i64} {
  func.func @_linear_kernel(%arg0: i32, %arg1: i32, %arg2: i32, %arg3: memref<16x32xf32, #tpu.memory_space<vmem>>, %arg4: memref<32x32xf32, #tpu.memory_space<vmem>>, %arg5: memref<1x32xf32, #tpu.memory_space<vmem>>, %arg6: memref<16x32xf32, #tpu.memory_space<vmem>>, %arg7: memref<1x32xf32, #tpu.memory_space<vmem>>, %arg8: memref<1x32xf32, #tpu.memory_space<vmem>>, %arg9: memref<16x32xf32, #tpu.memory_space<vmem>>) attributes {dimension_semantics = [#tpu.dimension_semantics<parallel>, #tpu.dimension_semantics<parallel>, #tpu.dimension_semantics<arbitrary>], iteration_bounds = array<i64: 1, 1, 1>, scalar_prefetch = 0 : i64, scratch_operands = 0 : i64, tpu.core_type = #tpu.core_type<tc>, window_params = [{transform_indices = @transform_0, window_bounds = array<i64: 16, 32>}, {transform_indices = @transform_1, window_bounds = array<i64: 32, 32>}, {transform_indices = @transform_2, window_bounds = array<i64: 1, 32>}, {transform_indices = @transform_3, window_bounds = array<i64: 16, 32>}, {transform_indices = @transform_4, window_bounds = array<i64: 1, 32>}, {transform_indices = @transform_5, window_bounds = array<i64: 1, 32>}, {transform_indices = @transform_6, window_bounds = array<i64: 16, 32>}]} {
    %c0 = arith.constant 0 : index
    %c0_0 = arith.constant 0 : index
    %0 = vector.load %arg3[%c0, %c0_0] : memref<16x32xf32, #tpu.memory_space<vmem>>, vector<16x32xf32>
    %1 = arith.truncf %0 : vector<16x32xf32> to vector<16x32xbf16>
    %c0_1 = arith.constant 0 : index
    %c0_2 = arith.constant 0 : index
    %2 = vector.load %arg4[%c0_1, %c0_2] : memref<32x32xf32, #tpu.memory_space<vmem>>, vector<32x32xf32>
    %3 = arith.truncf %2 : vector<32x32xf32> to vector<32x32xbf16>
    %cst = arith.constant dense<0.000000e+00> : vector<16x32xf32>
    %4 = tpu.matmul %1, %3, %cst {dimension_numbers = #tpu.dot_dimension_numbers<[1], [0], [0], [1], [0, 0, 1, 1], [], []>} : vector<16x32xbf16>, vector<32x32xbf16>, vector<16x32xf32> -> vector<16x32xf32>
    %c0_3 = arith.constant 0 : index
    %c0_4 = arith.constant 0 : index
    %5 = vector.load %arg5[%c0_3, %c0_4] : memref<1x32xf32, #tpu.memory_space<vmem>>, vector<1x32xf32>
    %6 = vector.broadcast %5 : vector<1x32xf32> to vector<16x32xf32>
    %7 = arith.addf %4, %6 : vector<16x32xf32>
    %c0_5 = arith.constant 0 : index
    %c0_6 = arith.constant 0 : index
    %8 = vector.load %arg6[%c0_5, %c0_6] : memref<16x32xf32, #tpu.memory_space<vmem>>, vector<16x32xf32>
    %9 = arith.addf %7, %8 : vector<16x32xf32>
    %cst_7 = arith.constant dense<0.000000e+00> : vector<16xf32>
    %10 = vector.multi_reduction <add>, %9, %cst_7 [1] : vector<16x32xf32> to vector<16xf32>
    %11 = vector.shape_cast %10 : vector<16xf32> to vector<16x1xf32>
    %cst_8 = arith.constant 3.200000e+01 : f32
    %12 = vector.broadcast %cst_8 : f32 to vector<16x1xf32>
    %13 = arith.divf %11, %12 : vector<16x1xf32>
    %14 = vector.broadcast %13 : vector<16x1xf32> to vector<16x32xf32>
    %15 = arith.subf %9, %14 : vector<16x32xf32>
    %16 = arith.mulf %15, %15 : vector<16x32xf32>
    %cst_9 = arith.constant dense<0.000000e+00> : vector<16xf32>
    %17 = vector.multi_reduction <add>, %16, %cst_9 [1] : vector<16x32xf32> to vector<16xf32>
    %18 = vector.shape_cast %17 : vector<16xf32> to vector<16x1xf32>
    %cst_10 = arith.constant 3.200000e+01 : f32
    %19 = vector.broadcast %cst_10 : f32 to vector<16x1xf32>
    %20 = arith.divf %18, %19 : vector<16x1xf32>
    %21 = vector.broadcast %13 : vector<16x1xf32> to vector<16x32xf32>
    %22 = arith.subf %9, %21 : vector<16x32xf32>
    %cst_11 = arith.constant 9.99999974E-6 : f32
    %23 = vector.broadcast %cst_11 : f32 to vector<16x1xf32>
    %24 = arith.addf %20, %23 : vector<16x1xf32>
    %25 = math.rsqrt %24 : vector<16x1xf32>
    %26 = vector.broadcast %25 : vector<16x1xf32> to vector<16x32xf32>
    %27 = arith.mulf %22, %26 : vector<16x32xf32>
    %c0_12 = arith.constant 0 : index
    %c0_13 = arith.constant 0 : index
    %28 = vector.load %arg7[%c0_12, %c0_13] : memref<1x32xf32, #tpu.memory_space<vmem>>, vector<1x32xf32>
    %29 = vector.broadcast %28 : vector<1x32xf32> to vector<16x32xf32>
    %30 = arith.mulf %27, %29 : vector<16x32xf32>
    %c0_14 = arith.constant 0 : index
    %c0_15 = arith.constant 0 : index
    %31 = vector.load %arg8[%c0_14, %c0_15] : memref<1x32xf32, #tpu.memory_space<vmem>>, vector<1x32xf32>
    %32 = vector.broadcast %31 : vector<1x32xf32> to vector<16x32xf32>
    %33 = arith.addf %30, %32 : vector<16x32xf32>
    %c0_16 = arith.constant 0 : index
    %c0_17 = arith.constant 0 : index
    %34 = vector.load %arg9[%c0_16, %c0_17] : memref<16x32xf32, #tpu.memory_space<vmem>>, vector<16x32xf32>
    tpu.vector_store %arg9[%c0_16, %c0_17], %33 {strides = array<i32>} : memref<16x32xf32, #tpu.memory_space<vmem>>, vector<16x32xf32>,
    return
  }
  func.func @transform_0(%arg0: i32, %arg1: i32, %arg2: i32) -> (i32, i32) {
    %c0_i32 = arith.constant 0 : i32
    return %arg0, %arg2 : i32, i32
  }
  func.func @transform_1(%arg0: i32, %arg1: i32, %arg2: i32) -> (i32, i32) {
    %c0_i32 = arith.constant 0 : i32
    return %arg2, %arg1 : i32, i32
  }
  func.func @transform_2(%arg0: i32, %arg1: i32, %arg2: i32) -> (i32, i32) {
    %c0_i32 = arith.constant 0 : i32
    %c0_i32_0 = arith.constant 0 : i32
    return %c0_i32, %arg1 : i32, i32
  }
  func.func @transform_3(%arg0: i32, %arg1: i32, %arg2: i32) -> (i32, i32) {
    %c0_i32 = arith.constant 0 : i32
    return %arg0, %arg1 : i32, i32
  }
  func.func @transform_4(%arg0: i32, %arg1: i32, %arg2: i32) -> (i32, i32) {
    %c0_i32 = arith.constant 0 : i32
    %c0_i32_0 = arith.constant 0 : i32
    return %c0_i32, %arg1 : i32, i32
  }
  func.func @transform_5(%arg0: i32, %arg1: i32, %arg2: i32) -> (i32, i32) {
    %c0_i32 = arith.constant 0 : i32
    %c0_i32_0 = arith.constant 0 : i32
    return %c0_i32, %arg1 : i32, i32
  }
  func.func @transform_6(%arg0: i32, %arg1: i32, %arg2: i32) -> (i32, i32) {
    %c0_i32 = arith.constant 0 : i32
    return %arg0, %arg1 : i32, i32
  }
}

module attributes {stable_mosaic.version = 11 : i64} {
  func.func @_flash_attn_kernel(%arg0: i32, %arg1: i32, %arg2: i32, %arg3: i32, %arg4: memref<1x1x1x8x16xf32, #tpu.memory_space<vmem>>, %arg5: memref<1x1x1x8x16xf32, #tpu.memory_space<vmem>>, %arg6: memref<1x1x1x8x16xf32, #tpu.memory_space<vmem>>, %arg7: memref<1x1x8x16xf32, #tpu.memory_space<vmem>>, %arg8: memref<8x1xf32, #tpu.memory_space<vmem>>, %arg9: memref<8x1xf32, #tpu.memory_space<vmem>>, %arg10: memref<8x16xf32, #tpu.memory_space<vmem>>) attributes {dimension_semantics = [#tpu.dimension_semantics<parallel>, #tpu.dimension_semantics<parallel>, #tpu.dimension_semantics<parallel>, #tpu.dimension_semantics<arbitrary>], iteration_bounds = array<i64: 2, 2, 1, 1>, scalar_prefetch = 0 : i64, scratch_operands = 3 : i64, tpu.core_type = #tpu.core_type<tc>, window_params = [{transform_indices = @transform_0, window_bounds = array<i64: 1, 1, 1, 8, 16>}, {transform_indices = @transform_1, window_bounds = array<i64: 1, 1, 1, 8, 16>}, {transform_indices = @transform_2, window_bounds = array<i64: 1, 1, 1, 8, 16>}, {transform_indices = @transform_3, window_bounds = array<i64: 1, 1, 8, 16>}]} {
    %c0_i32 = arith.constant 0 : i32
    %0 = arith.cmpi eq, %arg3, %c0_i32 : i32
    %1 = arith.extui %0 : i1 to i32
    %c0_i32_0 = arith.constant 0 : i32
    %2 = arith.cmpi ne, %1, %c0_i32_0 : i32
    scf.if %2 {
      %cst = arith.constant -1.000000e+30 : f32
      %13 = vector.broadcast %cst : f32 to vector<8x1xf32>
      %c0 = arith.constant 0 : index
      %c0_6 = arith.constant 0 : index
      %14 = vector.load %arg8[%c0, %c0_6] : memref<8x1xf32, #tpu.memory_space<vmem>>, vector<8x1xf32>
      tpu.vector_store %arg8[%c0, %c0_6], %13 {strides = array<i32>} : memref<8x1xf32, #tpu.memory_space<vmem>>, vector<8x1xf32>,
      %cst_7 = arith.constant 0.000000e+00 : f32
      %15 = vector.broadcast %cst_7 : f32 to vector<8x1xf32>
      %c0_8 = arith.constant 0 : index
      %c0_9 = arith.constant 0 : index
      %16 = vector.load %arg9[%c0_8, %c0_9] : memref<8x1xf32, #tpu.memory_space<vmem>>, vector<8x1xf32>
      tpu.vector_store %arg9[%c0_8, %c0_9], %15 {strides = array<i32>} : memref<8x1xf32, #tpu.memory_space<vmem>>, vector<8x1xf32>,
      %cst_10 = arith.constant 0.000000e+00 : f32
      %17 = vector.broadcast %cst_10 : f32 to vector<8x16xf32>
      %c0_11 = arith.constant 0 : index
      %c0_12 = arith.constant 0 : index
      %18 = vector.load %arg10[%c0_11, %c0_12] : memref<8x16xf32, #tpu.memory_space<vmem>>, vector<8x16xf32>
      tpu.vector_store %arg10[%c0_11, %c0_12], %17 {strides = array<i32>} : memref<8x16xf32, #tpu.memory_space<vmem>>, vector<8x16xf32>,
    } else {
    }
    %c8_i32 = arith.constant 8 : i32
    %3 = arith.muli %arg2, %c8_i32 : i32
    %c8_i32_1 = arith.constant 8 : i32
    %4 = arith.muli %arg3, %c8_i32_1 : i32
    %c8_i32_2 = arith.constant 8 : i32
    %5 = arith.addi %3, %c8_i32_2 : i32
    %c1_i32 = arith.constant 1 : i32
    %6 = arith.subi %5, %c1_i32 : i32
    %7 = arith.cmpi sle, %4, %6 : i32
    %8 = arith.extui %7 : i1 to i32
    %c0_i32_3 = arith.constant 0 : i32
    %9 = arith.cmpi ne, %8, %c0_i32_3 : i32
    scf.if %9 {
      %c0 = arith.constant 0 : index
      %c0_6 = arith.constant 0 : index
      %c0_7 = arith.constant 0 : index
      %c0_8 = arith.constant 0 : index
      %c0_9 = arith.constant 0 : index
      %13 = vector.load %arg4[%c0, %c0_6, %c0_7, %c0_8, %c0_9] : memref<1x1x1x8x16xf32, #tpu.memory_space<vmem>>, vector<1x1x1x8x16xf32>
      %14 = vector.shape_cast %13 : vector<1x1x1x8x16xf32> to vector<8x16xf32>
      %cst = arith.constant 2.500000e-01 : f32
      %15 = vector.broadcast %cst : f32 to vector<8x16xf32>
      %16 = arith.mulf %14, %15 : vector<8x16xf32>
      %17 = arith.truncf %16 : vector<8x16xf32> to vector<8x16xbf16>
      %c0_10 = arith.constant 0 : index
      %c0_11 = arith.constant 0 : index
      %c0_12 = arith.constant 0 : index
      %c0_13 = arith.constant 0 : index
      %c0_14 = arith.constant 0 : index
      %18 = vector.load %arg5[%c0_10, %c0_11, %c0_12, %c0_13, %c0_14] : memref<1x1x1x8x16xf32, #tpu.memory_space<vmem>>, vector<1x1x1x8x16xf32>
      %19 = vector.shape_cast %18 : vector<1x1x1x8x16xf32> to vector<8x16xf32>
      %20 = arith.truncf %19 : vector<8x16xf32> to vector<8x16xbf16>
      %cst_15 = arith.constant dense<0.000000e+00> : vector<8x8xf32>
      %21 = tpu.matmul %17, %20, %cst_15 {dimension_numbers = #tpu.dot_dimension_numbers<[1], [1], [0], [0], [0, 0, 1, 0], [], []>} : vector<8x16xbf16>, vector<8x16xbf16>, vector<8x8xf32> -> vector<8x8xf32>
      %22 = tpu.iota {dimensions = array<i32: 1>} : vector<8x8xi32>
      %23 = vector.broadcast %4 : i32 to vector<8x8xi32>
      %24 = arith.addi %23, %22 : vector<8x8xi32>
      %c8_i32_16 = arith.constant 8 : i32
      %25 = vector.broadcast %c8_i32_16 : i32 to vector<8x8xi32>
      %26 = arith.cmpi slt, %24, %25 : vector<8x8xi32>
      %27 = tpu.iota {dimensions = array<i32: 0>} : vector<8x8xi32>
      %28 = vector.broadcast %3 : i32 to vector<8x8xi32>
      %29 = arith.addi %28, %27 : vector<8x8xi32>
      %30 = arith.cmpi sle, %24, %29 : vector<8x8xi32>
      %31 = arith.andi %26, %30 : vector<8x8xi1>
      %cst_17 = arith.constant -1.000000e+30 : f32
      %32 = vector.broadcast %cst_17 : f32 to vector<8x8xf32>
      %33 = arith.select %31, %21, %32 : vector<8x8xi1>, vector<8x8xf32>
      %c0_18 = arith.constant 0 : index
      %c0_19 = arith.constant 0 : index
      %34 = vector.load %arg8[%c0_18, %c0_19] : memref<8x1xf32, #tpu.memory_space<vmem>>, vector<8x1xf32>
      %cst_20 = arith.constant dense<0xFF800000> : vector<8xf32>
      %35 = vector.multi_reduction <maximumf>, %33, %cst_20 [1] : vector<8x8xf32> to vector<8xf32>
      %36 = vector.shape_cast %35 : vector<8xf32> to vector<8x1xf32>
      %37 = arith.maximumf %34, %36 : vector<8x1xf32>
      %38 = arith.subf %34, %37 : vector<8x1xf32>
      %39 = math.exp %38 : vector<8x1xf32>
      %40 = vector.broadcast %37 : vector<8x1xf32> to vector<8x8xf32>
      %41 = arith.subf %33, %40 : vector<8x8xf32>
      %42 = math.exp %41 : vector<8x8xf32>
      %c0_21 = arith.constant 0 : index
      %c0_22 = arith.constant 0 : index
      %43 = vector.load %arg9[%c0_21, %c0_22] : memref<8x1xf32, #tpu.memory_space<vmem>>, vector<8x1xf32>
      %44 = arith.mulf %39, %43 : vector<8x1xf32>
      %cst_23 = arith.constant dense<0.000000e+00> : vector<8xf32>
      %45 = vector.multi_reduction <add>, %42, %cst_23 [1] : vector<8x8xf32> to vector<8xf32>
      %46 = vector.shape_cast %45 : vector<8xf32> to vector<8x1xf32>
      %47 = arith.addf %44, %46 : vector<8x1xf32>
      %c0_24 = arith.constant 0 : index
      %c0_25 = arith.constant 0 : index
      %48 = vector.load %arg9[%c0_24, %c0_25] : memref<8x1xf32, #tpu.memory_space<vmem>>, vector<8x1xf32>
      tpu.vector_store %arg9[%c0_24, %c0_25], %47 {strides = array<i32>} : memref<8x1xf32, #tpu.memory_space<vmem>>, vector<8x1xf32>,
      %c0_26 = arith.constant 0 : index
      %c0_27 = arith.constant 0 : index
      %49 = vector.load %arg10[%c0_26, %c0_27] : memref<8x16xf32, #tpu.memory_space<vmem>>, vector<8x16xf32>
      %50 = vector.broadcast %39 : vector<8x1xf32> to vector<8x16xf32>
      %51 = arith.mulf %50, %49 : vector<8x16xf32>
      %52 = arith.truncf %42 : vector<8x8xf32> to vector<8x8xbf16>
      %c0_28 = arith.constant 0 : index
      %c0_29 = arith.constant 0 : index
      %c0_30 = arith.constant 0 : index
      %c0_31 = arith.constant 0 : index
      %c0_32 = arith.constant 0 : index
      %53 = vector.load %arg6[%c0_28, %c0_29, %c0_30, %c0_31, %c0_32] : memref<1x1x1x8x16xf32, #tpu.memory_space<vmem>>, vector<1x1x1x8x16xf32>
      %54 = vector.shape_cast %53 : vector<1x1x1x8x16xf32> to vector<8x16xf32>
      %55 = arith.truncf %54 : vector<8x16xf32> to vector<8x16xbf16>
      %cst_33 = arith.constant dense<0.000000e+00> : vector<8x16xf32>
      %56 = tpu.matmul %52, %55, %cst_33 {dimension_numbers = #tpu.dot_dimension_numbers<[1], [0], [0], [1], [0, 0, 1, 1], [], []>} : vector<8x8xbf16>, vector<8x16xbf16>, vector<8x16xf32> -> vector<8x16xf32>
      %57 = arith.addf %51, %56 : vector<8x16xf32>
      %c0_34 = arith.constant 0 : index
      %c0_35 = arith.constant 0 : index
      %58 = vector.load %arg10[%c0_34, %c0_35] : memref<8x16xf32, #tpu.memory_space<vmem>>, vector<8x16xf32>
      tpu.vector_store %arg10[%c0_34, %c0_35], %57 {strides = array<i32>} : memref<8x16xf32, #tpu.memory_space<vmem>>, vector<8x16xf32>,
      %c0_36 = arith.constant 0 : index
      %c0_37 = arith.constant 0 : index
      %59 = vector.load %arg8[%c0_36, %c0_37] : memref<8x1xf32, #tpu.memory_space<vmem>>, vector<8x1xf32>
      tpu.vector_store %arg8[%c0_36, %c0_37], %37 {strides = array<i32>} : memref<8x1xf32, #tpu.memory_space<vmem>>, vector<8x1xf32>,
    } else {
    }
    %c0_i32_4 = arith.constant 0 : i32
    %10 = arith.cmpi eq, %arg3, %c0_i32_4 : i32
    %11 = arith.extui %10 : i1 to i32
    %c0_i32_5 = arith.constant 0 : i32
    %12 = arith.cmpi ne, %11, %c0_i32_5 : i32
    scf.if %12 {
      %c0 = arith.constant 0 : index
      %c0_6 = arith.constant 0 : index
      %13 = vector.load %arg10[%c0, %c0_6] : memref<8x16xf32, #tpu.memory_space<vmem>>, vector<8x16xf32>
      %c0_7 = arith.constant 0 : index
      %c0_8 = arith.constant 0 : index
      %14 = vector.load %arg9[%c0_7, %c0_8] : memref<8x1xf32, #tpu.memory_space<vmem>>, vector<8x1xf32>
      %15 = tpu.reciprocal %14 {approx = true} : vector<8x1xf32> -> vector<8x1xf32>
      %16 = vector.broadcast %15 : vector<8x1xf32> to vector<8x16xf32>
      %17 = arith.mulf %13, %16 : vector<8x16xf32>
      %c0_9 = arith.constant 0 : index
      %c0_10 = arith.constant 0 : index
      %c0_11 = arith.constant 0 : index
      %c0_12 = arith.constant 0 : index
      %18 = vector.load %arg7[%c0_9, %c0_10, %c0_11, %c0_12] : memref<1x1x8x16xf32, #tpu.memory_space<vmem>>, vector<1x1x8x16xf32>
      %19 = vector.shape_cast %18 : vector<1x1x8x16xf32> to vector<8x16xf32>
      %20 = vector.shape_cast %17 : vector<8x16xf32> to vector<1x1x8x16xf32>
      tpu.vector_store %arg7[%c0_9, %c0_10, %c0_11, %c0_12], %20 {strides = array<i32>} : memref<1x1x8x16xf32, #tpu.memory_space<vmem>>, vector<1x1x8x16xf32>,
    } else {
    }
    return
  }
  func.func @transform_0(%arg0: i32, %arg1: i32, %arg2: i32, %arg3: i32) -> (i32, i32, i32, i32, i32) {
    %c0_i32 = arith.constant 0 : i32
    %c0_i32_0 = arith.constant 0 : i32
    %c0_i32_1 = arith.constant 0 : i32
    return %c0_i32, %arg0, %arg1, %arg2, %c0_i32_0 : i32, i32, i32, i32, i32
  }
  func.func @transform_1(%arg0: i32, %arg1: i32, %arg2: i32, %arg3: i32) -> (i32, i32, i32, i32, i32) {
    %c1_i32 = arith.constant 1 : i32
    %c0_i32 = arith.constant 0 : i32
    %c0_i32_0 = arith.constant 0 : i32
    return %c1_i32, %arg0, %arg1, %arg3, %c0_i32 : i32, i32, i32, i32, i32
  }
  func.func @transform_2(%arg0: i32, %arg1: i32, %arg2: i32, %arg3: i32) -> (i32, i32, i32, i32, i32) {
    %c2_i32 = arith.constant 2 : i32
    %c0_i32 = arith.constant 0 : i32
    %c0_i32_0 = arith.constant 0 : i32
    return %c2_i32, %arg0, %arg1, %arg3, %c0_i32 : i32, i32, i32, i32, i32
  }
  func.func @transform_3(%arg0: i32, %arg1: i32, %arg2: i32, %arg3: i32) -> (i32, i32, i32, i32) {
    %c0_i32 = arith.constant 0 : i32
    %c0_i32_0 = arith.constant 0 : i32
    return %arg0, %arg1, %arg2, %c0_i32 : i32, i32, i32, i32
  }
}

module attributes {stable_mosaic.version = 11 : i64} {
  func.func @_linear_kernel(%arg0: i32, %arg1: i32, %arg2: i32, %arg3: memref<16x32xf32, #tpu.memory_space<vmem>>, %arg4: memref<32x32xf32, #tpu.memory_space<vmem>>, %arg5: memref<1x32xf32, #tpu.memory_space<vmem>>, %arg6: memref<16x32xf32, #tpu.memory_space<vmem>>) attributes {dimension_semantics = [#tpu.dimension_semantics<parallel>, #tpu.dimension_semantics<parallel>, #tpu.dimension_semantics<arbitrary>], iteration_bounds = array<i64: 1, 1, 1>, scalar_prefetch = 0 : i64, scratch_operands = 0 : i64, tpu.core_type = #tpu.core_type<tc>, window_params = [{transform_indices = @transform_0, window_bounds = array<i64: 16, 32>}, {transform_indices = @transform_1, window_bounds = array<i64: 32, 32>}, {transform_indices = @transform_2, window_bounds = array<i64: 1, 32>}, {transform_indices = @transform_3, window_bounds = array<i64: 16, 32>}]} {
    %c0 = arith.constant 0 : index
    %c0_0 = arith.constant 0 : index
    %0 = vector.load %arg3[%c0, %c0_0] : memref<16x32xf32, #tpu.memory_space<vmem>>, vector<16x32xf32>
    %1 = arith.truncf %0 : vector<16x32xf32> to vector<16x32xbf16>
    %c0_1 = arith.constant 0 : index
    %c0_2 = arith.constant 0 : index
    %2 = vector.load %arg4[%c0_1, %c0_2] : memref<32x32xf32, #tpu.memory_space<vmem>>, vector<32x32xf32>
    %3 = arith.truncf %2 : vector<32x32xf32> to vector<32x32xbf16>
    %cst = arith.constant dense<0.000000e+00> : vector<16x32xf32>
    %4 = tpu.matmul %1, %3, %cst {dimension_numbers = #tpu.dot_dimension_numbers<[1], [0], [0], [1], [0, 0, 1, 1], [], []>} : vector<16x32xbf16>, vector<32x32xbf16>, vector<16x32xf32> -> vector<16x32xf32>
    %c0_3 = arith.constant 0 : index
    %c0_4 = arith.constant 0 : index
    %5 = vector.load %arg5[%c0_3, %c0_4] : memref<1x32xf32, #tpu.memory_space<vmem>>, vector<1x32xf32>
    %6 = vector.broadcast %5 : vector<1x32xf32> to vector<16x32xf32>
    %7 = arith.addf %4, %6 : vector<16x32xf32>
    %c0_5 = arith.constant 0 : index
    %c0_6 = arith.constant 0 : index
    %8 = vector.load %arg6[%c0_5, %c0_6] : memref<16x32xf32, #tpu.memory_space<vmem>>, vector<16x32xf32>
    tpu.vector_store %arg6[%c0_5, %c0_6], %7 {strides = array<i32>} : memref<16x32xf32, #tpu.memory_space<vmem>>, vector<16x32xf32>,
    return
  }
  func.func @transform_0(%arg0: i32, %arg1: i32, %arg2: i32) -> (i32, i32) {
    %c0_i32 = arith.constant 0 : i32
    return %arg0, %arg2 : i32, i32
  }
  func.func @transform_1(%arg0: i32, %arg1: i32, %arg2: i32) -> (i32, i32) {
    %c0_i32 = arith.constant 0 : i32
    return %arg2, %arg1 : i32, i32
  }
  func.func @transform_2(%arg0: i32, %arg1: i32, %arg2: i32) -> (i32, i32) {
    %c0_i32 = arith.constant 0 : i32
    %c0_i32_0 = arith.constant 0 : i32
    return %c0_i32, %arg1 : i32, i32
  }
  func.func @transform_3(%arg0: i32, %arg1: i32, %arg2: i32) -> (i32, i32) {
    %c0_i32 = arith.constant 0 : i32
    return %arg0, %arg1 : i32, i32
  }
}

module attributes {stable_mosaic.version = 11 : i64} {
  func.func @_ffn_kernel(%arg0: i32, %arg1: memref<16x32xf32, #tpu.memory_space<vmem>>, %arg2: memref<32x64xf32, #tpu.memory_space<vmem>>, %arg3: memref<1x64xf32, #tpu.memory_space<vmem>>, %arg4: memref<64x32xf32, #tpu.memory_space<vmem>>, %arg5: memref<1x32xf32, #tpu.memory_space<vmem>>, %arg6: memref<16x32xf32, #tpu.memory_space<vmem>>, %arg7: memref<1x32xf32, #tpu.memory_space<vmem>>, %arg8: memref<1x32xf32, #tpu.memory_space<vmem>>, %arg9: memref<16x32xf32, #tpu.memory_space<vmem>>) attributes {dimension_semantics = [#tpu.dimension_semantics<parallel>], iteration_bounds = array<i64: 1>, scalar_prefetch = 0 : i64, scratch_operands = 0 : i64, tpu.core_type = #tpu.core_type<tc>, window_params = [{transform_indices = @transform_0, window_bounds = array<i64: 16, 32>}, {pipeline_mode = #tpu.pipeline_mode<synchronous>, transform_indices = @transform_1, window_bounds = array<i64: 32, 64>}, {pipeline_mode = #tpu.pipeline_mode<synchronous>, transform_indices = @transform_2, window_bounds = array<i64: 1, 64>}, {pipeline_mode = #tpu.pipeline_mode<synchronous>, transform_indices = @transform_3, window_bounds = array<i64: 64, 32>}, {pipeline_mode = #tpu.pipeline_mode<synchronous>, transform_indices = @transform_4, window_bounds = array<i64: 1, 32>}, {transform_indices = @transform_5, window_bounds = array<i64: 16, 32>}, {pipeline_mode = #tpu.pipeline_mode<synchronous>, transform_indices = @transform_6, window_bounds = array<i64: 1, 32>}, {pipeline_mode = #tpu.pipeline_mode<synchronous>, transform_indices = @transform_7, window_bounds = array<i64: 1, 32>}, {transform_indices = @transform_8, window_bounds = array<i64: 16, 32>}]} {
    %c0 = arith.constant 0 : index
    %c0_0 = arith.constant 0 : index
    %0 = vector.load %arg1[%c0, %c0_0] : memref<16x32xf32, #tpu.memory_space<vmem>>, vector<16x32xf32>
    %1 = arith.truncf %0 : vector<16x32xf32> to vector<16x32xbf16>
    %c0_1 = arith.constant 0 : index
    %c0_2 = arith.constant 0 : index
    %2 = vector.load %arg2[%c0_1, %c0_2] : memref<32x64xf32, #tpu.memory_space<vmem>>, vector<32x64xf32>
    %3 = arith.truncf %2 : vector<32x64xf32> to vector<32x64xbf16>
    %cst = arith.constant dense<0.000000e+00> : vector<16x64xf32>
    %4 = tpu.matmul %1, %3, %cst {dimension_numbers = #tpu.dot_dimension_numbers<[1], [0], [0], [1], [0, 0, 1, 1], [], []>} : vector<16x32xbf16>, vector<32x64xbf16>, vector<16x64xf32> -> vector<16x64xf32>
    %c0_3 = arith.constant 0 : index
    %c0_4 = arith.constant 0 : index
    %5 = vector.load %arg3[%c0_3, %c0_4] : memref<1x64xf32, #tpu.memory_space<vmem>>, vector<1x64xf32>
    %6 = vector.broadcast %5 : vector<1x64xf32> to vector<16x64xf32>
    %7 = arith.addf %4, %6 : vector<16x64xf32>
    %cst_5 = arith.constant 0.000000e+00 : f32
    %8 = vector.broadcast %cst_5 : f32 to vector<16x64xf32>
    %9 = arith.maximumf %7, %8 : vector<16x64xf32>
    %10 = arith.truncf %9 : vector<16x64xf32> to vector<16x64xbf16>
    %c0_6 = arith.constant 0 : index
    %c0_7 = arith.constant 0 : index
    %11 = vector.load %arg4[%c0_6, %c0_7] : memref<64x32xf32, #tpu.memory_space<vmem>>, vector<64x32xf32>
    %12 = arith.truncf %11 : vector<64x32xf32> to vector<64x32xbf16>
    %cst_8 = arith.constant dense<0.000000e+00> : vector<16x32xf32>
    %13 = tpu.matmul %10, %12, %cst_8 {dimension_numbers = #tpu.dot_dimension_numbers<[1], [0], [0], [1], [0, 0, 1, 1], [], []>} : vector<16x64xbf16>, vector<64x32xbf16>, vector<16x32xf32> -> vector<16x32xf32>
    %c0_9 = arith.constant 0 : index
    %c0_10 = arith.constant 0 : index
    %14 = vector.load %arg5[%c0_9, %c0_10] : memref<1x32xf32, #tpu.memory_space<vmem>>, vector<1x32xf32>
    %15 = vector.broadcast %14 : vector<1x32xf32> to vector<16x32xf32>
    %16 = arith.addf %13, %15 : vector<16x32xf32>
    %c0_11 = arith.constant 0 : index
    %c0_12 = arith.constant 0 : index
    %17 = vector.load %arg6[%c0_11, %c0_12] : memref<16x32xf32, #tpu.memory_space<vmem>>, vector<16x32xf32>
    %18 = arith.addf %16, %17 : vector<16x32xf32>
    %cst_13 = arith.constant dense<0.000000e+00> : vector<16xf32>
    %19 = vector.multi_reduction <add>, %18, %cst_13 [1] : vector<16x32xf32> to vector<16xf32>
    %20 = vector.shape_cast %19 : vector<16xf32> to vector<16x1xf32>
    %cst_14 = arith.constant 3.200000e+01 : f32
    %21 = vector.broadcast %cst_14 : f32 to vector<16x1xf32>
    %22 = arith.divf %20, %21 : vector<16x1xf32>
    %23 = vector.broadcast %22 : vector<16x1xf32> to vector<16x32xf32>
    %24 = arith.subf %18, %23 : vector<16x32xf32>
    %25 = arith.mulf %24, %24 : vector<16x32xf32>
    %cst_15 = arith.constant dense<0.000000e+00> : vector<16xf32>
    %26 = vector.multi_reduction <add>, %25, %cst_15 [1] : vector<16x32xf32> to vector<16xf32>
    %27 = vector.shape_cast %26 : vector<16xf32> to vector<16x1xf32>
    %cst_16 = arith.constant 3.200000e+01 : f32
    %28 = vector.broadcast %cst_16 : f32 to vector<16x1xf32>
    %29 = arith.divf %27, %28 : vector<16x1xf32>
    %30 = vector.broadcast %22 : vector<16x1xf32> to vector<16x32xf32>
    %31 = arith.subf %18, %30 : vector<16x32xf32>
    %cst_17 = arith.constant 9.99999974E-6 : f32
    %32 = vector.broadcast %cst_17 : f32 to vector<16x1xf32>
    %33 = arith.addf %29, %32 : vector<16x1xf32>
    %34 = math.rsqrt %33 : vector<16x1xf32>
    %35 = vector.broadcast %34 : vector<16x1xf32> to vector<16x32xf32>
    %36 = arith.mulf %31, %35 : vector<16x32xf32>
    %c0_18 = arith.constant 0 : index
    %c0_19 = arith.constant 0 : index
    %37 = vector.load %arg7[%c0_18, %c0_19] : memref<1x32xf32, #tpu.memory_space<vmem>>, vector<1x32xf32>
    %38 = vector.broadcast %37 : vector<1x32xf32> to vector<16x32xf32>
    %39 = arith.mulf %36, %38 : vector<16x32xf32>
    %c0_20 = arith.constant 0 : index
    %c0_21 = arith.constant 0 : index
    %40 = vector.load %arg8[%c0_20, %c0_21] : memref<1x32xf32, #tpu.memory_space<vmem>>, vector<1x32xf32>
    %41 = vector.broadcast %40 : vector<1x32xf32> to vector<16x32xf32>
    %42 = arith.addf %39, %41 : vector<16x32xf32>
    %c0_22 = arith.constant 0 : index
    %c0_23 = arith.constant 0 : index
    %43 = vector.load %arg9[%c0_22, %c0_23] : memref<16x32xf32, #tpu.memory_space<vmem>>, vector<16x32xf32>
    tpu.vector_store %arg9[%c0_22, %c0_23], %42 {strides = array<i32>} : memref<16x32xf32, #tpu.memory_space<vmem>>, vector<16x32xf32>,
    return
  }
  func.func @transform_0(%arg0: i32) -> (i32, i32) {
    %c0_i32 = arith.constant 0 : i32
    %c0_i32_0 = arith.constant 0 : i32
    return %arg0, %c0_i32 : i32, i32
  }
  func.func @transform_1(%arg0: i32) -> (i32, i32) {
    %c0_i32 = arith.constant 0 : i32
    %c0_i32_0 = arith.constant 0 : i32
    %c0_i32_1 = arith.constant 0 : i32
    return %c0_i32, %c0_i32_0 : i32, i32
  }
  func.func @transform_2(%arg0: i32) -> (i32, i32) {
    %c0_i32 = arith.constant 0 : i32
    %c0_i32_0 = arith.constant 0 : i32
    %c0_i32_1 = arith.constant 0 : i32
    return %c0_i32, %c0_i32_0 : i32, i32
  }
  func.func @transform_3(%arg0: i32) -> (i32, i32) {
    %c0_i32 = arith.constant 0 : i32
    %c0_i32_0 = arith.constant 0 : i32
    %c0_i32_1 = arith.constant 0 : i32
    return %c0_i32, %c0_i32_0 : i32, i32
  }
  func.func @transform_4(%arg0: i32) -> (i32, i32) {
    %c0_i32 = arith.constant 0 : i32
    %c0_i32_0 = arith.constant 0 : i32
    %c0_i32_1 = arith.constant 0 : i32
    return %c0_i32, %c0_i32_0 : i32, i32
  }
  func.func @transform_5(%arg0: i32) -> (i32, i32) {
    %c0_i32 = arith.constant 0 : i32
    %c0_i32_0 = arith.constant 0 : i32
    return %arg0, %c0_i32 : i32, i32
  }
  func.func @transform_6(%arg0: i32) -> (i32, i32) {
    %c0_i32 = arith.constant 0 : i32
    %c0_i32_0 = arith.constant 0 : i32
    %c0_i32_1 = arith.constant 0 : i32
    return %c0_i32, %c0_i32_0 : i32, i32
  }
  func.func @transform_7(%arg0: i32) -> (i32, i32) {
    %c0_i32 = arith.constant 0 : i32
    %c0_i32_0 = arith.constant 0 : i32
    %c0_i32_1 = arith.constant 0 : i32
    return %c0_i32, %c0_i32_0 : i32, i32
  }
  func.func @transform_8(%arg0: i32) -> (i32, i32) {
    %c0_i32 = arith.constant 0 : i32
    %c0_i32_0 = arith.constant 0 : i32
    return %arg0, %c0_i32 : i32, i32
  }
}

module attributes {stable_mosaic.version = 11 : i64} {
  func.func @_linear_kernel(%arg0: i32, %arg1: i32, %arg2: i32, %arg3: memref<16x32xf32, #tpu.memory_space<vmem>>, %arg4: memref<32x64xf32, #tpu.memory_space<vmem>>, %arg5: memref<1x64xf32, #tpu.memory_space<vmem>>, %arg6: memref<16x64xf32, #tpu.memory_space<vmem>>) attributes {dimension_semantics = [#tpu.dimension_semantics<parallel>, #tpu.dimension_semantics<parallel>, #tpu.dimension_semantics<arbitrary>], iteration_bounds = array<i64: 1, 1, 1>, scalar_prefetch = 0 : i64, scratch_operands = 0 : i64, tpu.core_type = #tpu.core_type<tc>, window_params = [{transform_indices = @transform_0, window_bounds = array<i64: 16, 32>}, {transform_indices = @transform_1, window_bounds = array<i64: 32, 64>}, {transform_indices = @transform_2, window_bounds = array<i64: 1, 64>}, {transform_indices = @transform_3, window_bounds = array<i64: 16, 64>}]} {
    %c0 = arith.constant 0 : index
    %c0_0 = arith.constant 0 : index
    %0 = vector.load %arg3[%c0, %c0_0] : memref<16x32xf32, #tpu.memory_space<vmem>>, vector<16x32xf32>
    %1 = arith.truncf %0 : vector<16x32xf32> to vector<16x32xbf16>
    %c0_1 = arith.constant 0 : index
    %c0_2 = arith.constant 0 : index
    %2 = vector.load %arg4[%c0_1, %c0_2] : memref<32x64xf32, #tpu.memory_space<vmem>>, vector<32x64xf32>
    %3 = arith.truncf %2 : vector<32x64xf32> to vector<32x64xbf16>
    %cst = arith.constant dense<0.000000e+00> : vector<16x64xf32>
    %4 = tpu.matmul %1, %3, %cst {dimension_numbers = #tpu.dot_dimension_numbers<[1], [0], [0], [1], [0, 0, 1, 1], [], []>} : vector<16x32xbf16>, vector<32x64xbf16>, vector<16x64xf32> -> vector<16x64xf32>
    %c0_3 = arith.constant 0 : index
    %c0_4 = arith.constant 0 : index
    %5 = vector.load %arg5[%c0_3, %c0_4] : memref<1x64xf32, #tpu.memory_space<vmem>>, vector<1x64xf32>
    %6 = vector.broadcast %5 : vector<1x64xf32> to vector<16x64xf32>
    %7 = arith.addf %4, %6 : vector<16x64xf32>
    %c0_5 = arith.constant 0 : index
    %c0_6 = arith.constant 0 : index
    %8 = vector.load %arg6[%c0_5, %c0_6] : memref<16x64xf32, #tpu.memory_space<vmem>>, vector<16x64xf32>
    tpu.vector_store %arg6[%c0_5, %c0_6], %7 {strides = array<i32>} : memref<16x64xf32, #tpu.memory_space<vmem>>, vector<16x64xf32>,
    return
  }
  func.func @transform_0(%arg0: i32, %arg1: i32, %arg2: i32) -> (i32, i32) {
    %c0_i32 = arith.constant 0 : i32
    return %arg0, %arg2 : i32, i32
  }
  func.func @transform_1(%arg0: i32, %arg1: i32, %arg2: i32) -> (i32, i32) {
    %c0_i32 = arith.constant 0 : i32
    return %arg2, %arg1 : i32, i32
  }
  func.func @transform_2(%arg0: i32, %arg1: i32, %arg2: i32) -> (i32, i32) {
    %c0_i32 = arith.constant 0 : i32
    %c0_i32_0 = arith.constant 0 : i32
    return %c0_i32, %arg1 : i32, i32
  }
  func.func @transform_3(%arg0: i32, %arg1: i32, %arg2: i32) -> (i32, i32) {
    %c0_i32 = arith.constant 0 : i32
    return %arg0, %arg1 : i32, i32
  }
}

module attributes {stable_mosaic.version = 11 : i64} {
  func.func @_flash_attn_kernel(%arg0: i32, %arg1: i32, %arg2: i32, %arg3: i32, %arg4: memref<1x1x1x8x16xf32, #tpu.memory_space<vmem>>, %arg5: memref<1x1x1x8x16xf32, #tpu.memory_space<vmem>>, %arg6: memref<1x1x1x8x16xf32, #tpu.memory_space<vmem>>, %arg7: memref<1x1x8x16xf32, #tpu.memory_space<vmem>>, %arg8: memref<8x1xf32, #tpu.memory_space<vmem>>, %arg9: memref<8x1xf32, #tpu.memory_space<vmem>>, %arg10: memref<8x16xf32, #tpu.memory_space<vmem>>) attributes {dimension_semantics = [#tpu.dimension_semantics<parallel>, #tpu.dimension_semantics<parallel>, #tpu.dimension_semantics<parallel>, #tpu.dimension_semantics<arbitrary>], iteration_bounds = array<i64: 2, 2, 1, 1>, scalar_prefetch = 0 : i64, scratch_operands = 3 : i64, tpu.core_type = #tpu.core_type<tc>, window_params = [{transform_indices = @transform_0, window_bounds = array<i64: 1, 1, 1, 8, 16>}, {transform_indices = @transform_1, window_bounds = array<i64: 1, 1, 1, 8, 16>}, {transform_indices = @transform_2, window_bounds = array<i64: 1, 1, 1, 8, 16>}, {transform_indices = @transform_3, window_bounds = array<i64: 1, 1, 8, 16>}]} {
    %c0_i32 = arith.constant 0 : i32
    %0 = arith.cmpi eq, %arg3, %c0_i32 : i32
    %1 = arith.extui %0 : i1 to i32
    %c0_i32_0 = arith.constant 0 : i32
    %2 = arith.cmpi ne, %1, %c0_i32_0 : i32
    scf.if %2 {
      %cst_35 = arith.constant -1.000000e+30 : f32
      %49 = vector.broadcast %cst_35 : f32 to vector<8x1xf32>
      %c0_36 = arith.constant 0 : index
      %c0_37 = arith.constant 0 : index
      %50 = vector.load %arg8[%c0_36, %c0_37] : memref<8x1xf32, #tpu.memory_space<vmem>>, vector<8x1xf32>
      tpu.vector_store %arg8[%c0_36, %c0_37], %49 {strides = array<i32>} : memref<8x1xf32, #tpu.memory_space<vmem>>, vector<8x1xf32>,
      %cst_38 = arith.constant 0.000000e+00 : f32
      %51 = vector.broadcast %cst_38 : f32 to vector<8x1xf32>
      %c0_39 = arith.constant 0 : index
      %c0_40 = arith.constant 0 : index
      %52 = vector.load %arg9[%c0_39, %c0_40] : memref<8x1xf32, #tpu.memory_space<vmem>>, vector<8x1xf32>
      tpu.vector_store %arg9[%c0_39, %c0_40], %51 {strides = array<i32>} : memref<8x1xf32, #tpu.memory_space<vmem>>, vector<8x1xf32>,
      %cst_41 = arith.constant 0.000000e+00 : f32
      %53 = vector.broadcast %cst_41 : f32 to vector<8x16xf32>
      %c0_42 = arith.constant 0 : index
      %c0_43 = arith.constant 0 : index
      %54 = vector.load %arg10[%c0_42, %c0_43] : memref<8x16xf32, #tpu.memory_space<vmem>>, vector<8x16xf32>
      tpu.vector_store %arg10[%c0_42, %c0_43], %53 {strides = array<i32>} : memref<8x16xf32, #tpu.memory_space<vmem>>, vector<8x16xf32>,
    } else {
    }
    %c8_i32 = arith.constant 8 : i32
    %3 = arith.muli %arg3, %c8_i32 : i32
    %c0 = arith.constant 0 : index
    %c0_1 = arith.constant 0 : index
    %c0_2 = arith.constant 0 : index
    %c0_3 = arith.constant 0 : index
    %c0_4 = arith.constant 0 : index
    %4 = vector.load %arg4[%c0, %c0_1, %c0_2, %c0_3, %c0_4] : memref<1x1x1x8x16xf32, #tpu.memory_space<vmem>>, vector<1x1x1x8x16xf32>
    %5 = vector.shape_cast %4 : vector<1x1x1x8x16xf32> to vector<8x16xf32>
    %cst = arith.constant 2.500000e-01 : f32
    %6 = vector.broadcast %cst : f32 to vector<8x16xf32>
    %7 = arith.mulf %5, %6 : vector<8x16xf32>
    %8 = arith.truncf %7 : vector<8x16xf32> to vector<8x16xbf16>
    %c0_5 = arith.constant 0 : index
    %c0_6 = arith.constant 0 : index
    %c0_7 = arith.constant 0 : index
    %c0_8 = arith.constant 0 : index
    %c0_9 = arith.constant 0 : index
    %9 = vector.load %arg5[%c0_5, %c0_6, %c0_7, %c0_8, %c0_9] : memref<1x1x1x8x16xf32, #tpu.memory_space<vmem>>, vector<1x1x1x8x16xf32>
    %10 = vector.shape_cast %9 : vector<1x1x1x8x16xf32> to vector<8x16xf32>
    %11 = arith.truncf %10 : vector<8x16xf32> to vector<8x16xbf16>
    %cst_10 = arith.constant dense<0.000000e+00> : vector<8x8xf32>
    %12 = tpu.matmul %8, %11, %cst_10 {dimension_numbers = #tpu.dot_dimension_numbers<[1], [1], [0], [0], [0, 0, 1, 0], [], []>} : vector<8x16xbf16>, vector<8x16xbf16>, vector<8x8xf32> -> vector<8x8xf32>
    %13 = tpu.iota {dimensions = array<i32: 1>} : vector<8x8xi32>
    %14 = vector.broadcast %3 : i32 to vector<8x8xi32>
    %15 = arith.addi %14, %13 : vector<8x8xi32>
    %c8_i32_11 = arith.constant 8 : i32
    %16 = vector.broadcast %c8_i32_11 : i32 to vector<8x8xi32>
    %17 = arith.cmpi slt, %15, %16 : vector<8x8xi32>
    %cst_12 = arith.constant -1.000000e+30 : f32
    %18 = vector.broadcast %cst_12 : f32 to vector<8x8xf32>
    %19 = arith.select %17, %12, %18 : vector<8x8xi1>, vector<8x8xf32>
    %c0_13 = arith.constant 0 : index
    %c0_14 = arith.constant 0 : index
    %20 = vector.load %arg8[%c0_13, %c0_14] : memref<8x1xf32, #tpu.memory_space<vmem>>, vector<8x1xf32>
    %cst_15 = arith.constant dense<0xFF800000> : vector<8xf32>
    %21 = vector.multi_reduction <maximumf>, %19, %cst_15 [1] : vector<8x8xf32> to vector<8xf32>
    %22 = vector.shape_cast %21 : vector<8xf32> to vector<8x1xf32>
    %23 = arith.maximumf %20, %22 : vector<8x1xf32>
    %24 = arith.subf %20, %23 : vector<8x1xf32>
    %25 = math.exp %24 : vector<8x1xf32>
    %26 = vector.broadcast %23 : vector<8x1xf32> to vector<8x8xf32>
    %27 = arith.subf %19, %26 : vector<8x8xf32>
    %28 = math.exp %27 : vector<8x8xf32>
    %c0_16 = arith.constant 0 : index
    %c0_17 = arith.constant 0 : index
    %29 = vector.load %arg9[%c0_16, %c0_17] : memref<8x1xf32, #tpu.memory_space<vmem>>, vector<8x1xf32>
    %30 = arith.mulf %25, %29 : vector<8x1xf32>
    %cst_18 = arith.constant dense<0.000000e+00> : vector<8xf32>
    %31 = vector.multi_reduction <add>, %28, %cst_18 [1] : vector<8x8xf32> to vector<8xf32>
    %32 = vector.shape_cast %31 : vector<8xf32> to vector<8x1xf32>
    %33 = arith.addf %30, %32 : vector<8x1xf32>
    %c0_19 = arith.constant 0 : index
    %c0_20 = arith.constant 0 : index
    %34 = vector.load %arg9[%c0_19, %c0_20] : memref<8x1xf32, #tpu.memory_space<vmem>>, vector<8x1xf32>
    tpu.vector_store %arg9[%c0_19, %c0_20], %33 {strides = array<i32>} : memref<8x1xf32, #tpu.memory_space<vmem>>, vector<8x1xf32>,
    %c0_21 = arith.constant 0 : index
    %c0_22 = arith.constant 0 : index
    %35 = vector.load %arg10[%c0_21, %c0_22] : memref<8x16xf32, #tpu.memory_space<vmem>>, vector<8x16xf32>
    %36 = vector.broadcast %25 : vector<8x1xf32> to vector<8x16xf32>
    %37 = arith.mulf %36, %35 : vector<8x16xf32>
    %38 = arith.truncf %28 : vector<8x8xf32> to vector<8x8xbf16>
    %c0_23 = arith.constant 0 : index
    %c0_24 = arith.constant 0 : index
    %c0_25 = arith.constant 0 : index
    %c0_26 = arith.constant 0 : index
    %c0_27 = arith.constant 0 : index
    %39 = vector.load %arg6[%c0_23, %c0_24, %c0_25, %c0_26, %c0_27] : memref<1x1x1x8x16xf32, #tpu.memory_space<vmem>>, vector<1x1x1x8x16xf32>
    %40 = vector.shape_cast %39 : vector<1x1x1x8x16xf32> to vector<8x16xf32>
    %41 = arith.truncf %40 : vector<8x16xf32> to vector<8x16xbf16>
    %cst_28 = arith.constant dense<0.000000e+00> : vector<8x16xf32>
    %42 = tpu.matmul %38, %41, %cst_28 {dimension_numbers = #tpu.dot_dimension_numbers<[1], [0], [0], [1], [0, 0, 1, 1], [], []>} : vector<8x8xbf16>, vector<8x16xbf16>, vector<8x16xf32> -> vector<8x16xf32>
    %43 = arith.addf %37, %42 : vector<8x16xf32>
    %c0_29 = arith.constant 0 : index
    %c0_30 = arith.constant 0 : index
    %44 = vector.load %arg10[%c0_29, %c0_30] : memref<8x16xf32, #tpu.memory_space<vmem>>, vector<8x16xf32>
    tpu.vector_store %arg10[%c0_29, %c0_30], %43 {strides = array<i32>} : memref<8x16xf32, #tpu.memory_space<vmem>>, vector<8x16xf32>,
    %c0_31 = arith.constant 0 : index
    %c0_32 = arith.constant 0 : index
    %45 = vector.load %arg8[%c0_31, %c0_32] : memref<8x1xf32, #tpu.memory_space<vmem>>, vector<8x1xf32>
    tpu.vector_store %arg8[%c0_31, %c0_32], %23 {strides = array<i32>} : memref<8x1xf32, #tpu.memory_space<vmem>>, vector<8x1xf32>,
    %c0_i32_33 = arith.constant 0 : i32
    %46 = arith.cmpi eq, %arg3, %c0_i32_33 : i32
    %47 = arith.extui %46 : i1 to i32
    %c0_i32_34 = arith.constant 0 : i32
    %48 = arith.cmpi ne, %47, %c0_i32_34 : i32
    scf.if %48 {
      %c0_35 = arith.constant 0 : index
      %c0_36 = arith.constant 0 : index
      %49 = vector.load %arg10[%c0_35, %c0_36] : memref<8x16xf32, #tpu.memory_space<vmem>>, vector<8x16xf32>
      %c0_37 = arith.constant 0 : index
      %c0_38 = arith.constant 0 : index
      %50 = vector.load %arg9[%c0_37, %c0_38] : memref<8x1xf32, #tpu.memory_space<vmem>>, vector<8x1xf32>
      %51 = tpu.reciprocal %50 {approx = true} : vector<8x1xf32> -> vector<8x1xf32>
      %52 = vector.broadcast %51 : vector<8x1xf32> to vector<8x16xf32>
      %53 = arith.mulf %49, %52 : vector<8x16xf32>
      %c0_39 = arith.constant 0 : index
      %c0_40 = arith.constant 0 : index
      %c0_41 = arith.constant 0 : index
      %c0_42 = arith.constant 0 : index
      %54 = vector.load %arg7[%c0_39, %c0_40, %c0_41, %c0_42] : memref<1x1x8x16xf32, #tpu.memory_space<vmem>>, vector<1x1x8x16xf32>
      %55 = vector.shape_cast %54 : vector<1x1x8x16xf32> to vector<8x16xf32>
      %56 = vector.shape_cast %53 : vector<8x16xf32> to vector<1x1x8x16xf32>
      tpu.vector_store %arg7[%c0_39, %c0_40, %c0_41, %c0_42], %56 {strides = array<i32>} : memref<1x1x8x16xf32, #tpu.memory_space<vmem>>, vector<1x1x8x16xf32>,
    } else {
    }
    return
  }
  func.func @transform_0(%arg0: i32, %arg1: i32, %arg2: i32, %arg3: i32) -> (i32, i32, i32, i32, i32) {
    %c0_i32 = arith.constant 0 : i32
    %c0_i32_0 = arith.constant 0 : i32
    %c0_i32_1 = arith.constant 0 : i32
    return %c0_i32, %arg0, %arg1, %arg2, %c0_i32_0 : i32, i32, i32, i32, i32
  }
  func.func @transform_1(%arg0: i32, %arg1: i32, %arg2: i32, %arg3: i32) -> (i32, i32, i32, i32, i32) {
    %c1_i32 = arith.constant 1 : i32
    %c0_i32 = arith.constant 0 : i32
    %c0_i32_0 = arith.constant 0 : i32
    return %c1_i32, %arg0, %arg1, %arg3, %c0_i32 : i32, i32, i32, i32, i32
  }
  func.func @transform_2(%arg0: i32, %arg1: i32, %arg2: i32, %arg3: i32) -> (i32, i32, i32, i32, i32) {
    %c2_i32 = arith.constant 2 : i32
    %c0_i32 = arith.constant 0 : i32
    %c0_i32_0 = arith.constant 0 : i32
    return %c2_i32, %arg0, %arg1, %arg3, %c0_i32 : i32, i32, i32, i32, i32
  }
  func.func @transform_3(%arg0: i32, %arg1: i32, %arg2: i32, %arg3: i32) -> (i32, i32, i32, i32) {
    %c0_i32 = arith.constant 0 : i32
    %c0_i32_0 = arith.constant 0 : i32
    return %arg0, %arg1, %arg2, %c0_i32 : i32, i32, i32, i32
  }
}

module attributes {stable_mosaic.version = 11 : i64} {
  func.func @_flash_attn_kernel(%arg0: i32, %arg1: i32, %arg2: i32, %arg3: i32, %arg4: memref<1x1x1x8x16xf32, #tpu.memory_space<vmem>>, %arg5: memref<1x1x1x8x16xf32, #tpu.memory_space<vmem>>, %arg6: memref<1x1x1x8x16xf32, #tpu.memory_space<vmem>>, %arg7: memref<1x1x8x16xf32, #tpu.memory_space<vmem>>, %arg8: memref<8x1xf32, #tpu.memory_space<vmem>>, %arg9: memref<8x1xf32, #tpu.memory_space<vmem>>, %arg10: memref<8x16xf32, #tpu.memory_space<vmem>>) attributes {dimension_semantics = [#tpu.dimension_semantics<parallel>, #tpu.dimension_semantics<parallel>, #tpu.dimension_semantics<parallel>, #tpu.dimension_semantics<arbitrary>], iteration_bounds = array<i64: 2, 2, 1, 1>, scalar_prefetch = 0 : i64, scratch_operands = 3 : i64, tpu.core_type = #tpu.core_type<tc>, window_params = [{transform_indices = @transform_0, window_bounds = array<i64: 1, 1, 1, 8, 16>}, {transform_indices = @transform_1, window_bounds = array<i64: 1, 1, 1, 8, 16>}, {transform_indices = @transform_2, window_bounds = array<i64: 1, 1, 1, 8, 16>}, {transform_indices = @transform_3, window_bounds = array<i64: 1, 1, 8, 16>}]} {
    %c0_i32 = arith.constant 0 : i32
    %0 = arith.cmpi eq, %arg3, %c0_i32 : i32
    %1 = arith.extui %0 : i1 to i32
    %c0_i32_0 = arith.constant 0 : i32
    %2 = arith.cmpi ne, %1, %c0_i32_0 : i32
    scf.if %2 {
      %cst_35 = arith.constant -1.000000e+30 : f32
      %49 = vector.broadcast %cst_35 : f32 to vector<8x1xf32>
      %c0_36 = arith.constant 0 : index
      %c0_37 = arith.constant 0 : index
      %50 = vector.load %arg8[%c0_36, %c0_37] : memref<8x1xf32, #tpu.memory_space<vmem>>, vector<8x1xf32>
      tpu.vector_store %arg8[%c0_36, %c0_37], %49 {strides = array<i32>} : memref<8x1xf32, #tpu.memory_space<vmem>>, vector<8x1xf32>,
      %cst_38 = arith.constant 0.000000e+00 : f32
      %51 = vector.broadcast %cst_38 : f32 to vector<8x1xf32>
      %c0_39 = arith.constant 0 : index
      %c0_40 = arith.constant 0 : index
      %52 = vector.load %arg9[%c0_39, %c0_40] : memref<8x1xf32, #tpu.memory_space<vmem>>, vector<8x1xf32>
      tpu.vector_store %arg9[%c0_39, %c0_40], %51 {strides = array<i32>} : memref<8x1xf32, #tpu.memory_space<vmem>>, vector<8x1xf32>,
      %cst_41 = arith.constant 0.000000e+00 : f32
      %53 = vector.broadcast %cst_41 : f32 to vector<8x16xf32>
      %c0_42 = arith.constant 0 : index
      %c0_43 = arith.constant 0 : index
      %54 = vector.load %arg10[%c0_42, %c0_43] : memref<8x16xf32, #tpu.memory_space<vmem>>, vector<8x16xf32>
      tpu.vector_store %arg10[%c0_42, %c0_43], %53 {strides = array<i32>} : memref<8x16xf32, #tpu.memory_space<vmem>>, vector<8x16xf32>,
    } else {
    }
    %c8_i32 = arith.constant 8 : i32
    %3 = arith.muli %arg3, %c8_i32 : i32
    %c0 = arith.constant 0 : index
    %c0_1 = arith.constant 0 : index
    %c0_2 = arith.constant 0 : index
    %c0_3 = arith.constant 0 : index
    %c0_4 = arith.constant 0 : index
    %4 = vector.load %arg4[%c0, %c0_1, %c0_2, %c0_3, %c0_4] : memref<1x1x1x8x16xf32, #tpu.memory_space<vmem>>, vector<1x1x1x8x16xf32>
    %5 = vector.shape_cast %4 : vector<1x1x1x8x16xf32> to vector<8x16xf32>
    %cst = arith.constant 2.500000e-01 : f32
    %6 = vector.broadcast %cst : f32 to vector<8x16xf32>
    %7 = arith.mulf %5, %6 : vector<8x16xf32>
    %8 = arith.truncf %7 : vector<8x16xf32> to vector<8x16xbf16>
    %c0_5 = arith.constant 0 : index
    %c0_6 = arith.constant 0 : index
    %c0_7 = arith.constant 0 : index
    %c0_8 = arith.constant 0 : index
    %c0_9 = arith.constant 0 : index
    %9 = vector.load %arg5[%c0_5, %c0_6, %c0_7, %c0_8, %c0_9] : memref<1x1x1x8x16xf32, #tpu.memory_space<vmem>>, vector<1x1x1x8x16xf32>
    %10 = vector.shape_cast %9 : vector<1x1x1x8x16xf32> to vector<8x16xf32>
    %11 = arith.truncf %10 : vector<8x16xf32> to vector<8x16xbf16>
    %cst_10 = arith.constant dense<0.000000e+00> : vector<8x8xf32>
    %12 = tpu.matmul %8, %11, %cst_10 {dimension_numbers = #tpu.dot_dimension_numbers<[1], [1], [0], [0], [0, 0, 1, 0], [], []>} : vector<8x16xbf16>, vector<8x16xbf16>, vector<8x8xf32> -> vector<8x8xf32>
    %13 = tpu.iota {dimensions = array<i32: 1>} : vector<8x8xi32>
    %14 = vector.broadcast %3 : i32 to vector<8x8xi32>
    %15 = arith.addi %14, %13 : vector<8x8xi32>
    %c8_i32_11 = arith.constant 8 : i32
    %16 = vector.broadcast %c8_i32_11 : i32 to vector<8x8xi32>
    %17 = arith.cmpi slt, %15, %16 : vector<8x8xi32>
    %cst_12 = arith.constant -1.000000e+30 : f32
    %18 = vector.broadcast %cst_12 : f32 to vector<8x8xf32>
    %19 = arith.select %17, %12, %18 : vector<8x8xi1>, vector<8x8xf32>
    %c0_13 = arith.constant 0 : index
    %c0_14 = arith.constant 0 : index
    %20 = vector.load %arg8[%c0_13, %c0_14] : memref<8x1xf32, #tpu.memory_space<vmem>>, vector<8x1xf32>
    %cst_15 = arith.constant dense<0xFF800000> : vector<8xf32>
    %21 = vector.multi_reduction <maximumf>, %19, %cst_15 [1] : vector<8x8xf32> to vector<8xf32>
    %22 = vector.shape_cast %21 : vector<8xf32> to vector<8x1xf32>
    %23 = arith.maximumf %20, %22 : vector<8x1xf32>
    %24 = arith.subf %20, %23 : vector<8x1xf32>
    %25 = math.exp %24 : vector<8x1xf32>
    %26 = vector.broadcast %23 : vector<8x1xf32> to vector<8x8xf32>
    %27 = arith.subf %19, %26 : vector<8x8xf32>
    %28 = math.exp %27 : vector<8x8xf32>
    %c0_16 = arith.constant 0 : index
    %c0_17 = arith.constant 0 : index
    %29 = vector.load %arg9[%c0_16, %c0_17] : memref<8x1xf32, #tpu.memory_space<vmem>>, vector<8x1xf32>
    %30 = arith.mulf %25, %29 : vector<8x1xf32>
    %cst_18 = arith.constant dense<0.000000e+00> : vector<8xf32>
    %31 = vector.multi_reduction <add>, %28, %cst_18 [1] : vector<8x8xf32> to vector<8xf32>
    %32 = vector.shape_cast %31 : vector<8xf32> to vector<8x1xf32>
    %33 = arith.addf %30, %32 : vector<8x1xf32>
    %c0_19 = arith.constant 0 : index
    %c0_20 = arith.constant 0 : index
    %34 = vector.load %arg9[%c0_19, %c0_20] : memref<8x1xf32, #tpu.memory_space<vmem>>, vector<8x1xf32>
    tpu.vector_store %arg9[%c0_19, %c0_20], %33 {strides = array<i32>} : memref<8x1xf32, #tpu.memory_space<vmem>>, vector<8x1xf32>,
    %c0_21 = arith.constant 0 : index
    %c0_22 = arith.constant 0 : index
    %35 = vector.load %arg10[%c0_21, %c0_22] : memref<8x16xf32, #tpu.memory_space<vmem>>, vector<8x16xf32>
    %36 = vector.broadcast %25 : vector<8x1xf32> to vector<8x16xf32>
    %37 = arith.mulf %36, %35 : vector<8x16xf32>
    %38 = arith.truncf %28 : vector<8x8xf32> to vector<8x8xbf16>
    %c0_23 = arith.constant 0 : index
    %c0_24 = arith.constant 0 : index
    %c0_25 = arith.constant 0 : index
    %c0_26 = arith.constant 0 : index
    %c0_27 = arith.constant 0 : index
    %39 = vector.load %arg6[%c0_23, %c0_24, %c0_25, %c0_26, %c0_27] : memref<1x1x1x8x16xf32, #tpu.memory_space<vmem>>, vector<1x1x1x8x16xf32>
    %40 = vector.shape_cast %39 : vector<1x1x1x8x16xf32> to vector<8x16xf32>
    %41 = arith.truncf %40 : vector<8x16xf32> to vector<8x16xbf16>
    %cst_28 = arith.constant dense<0.000000e+00> : vector<8x16xf32>
    %42 = tpu.matmul %38, %41, %cst_28 {dimension_numbers = #tpu.dot_dimension_numbers<[1], [0], [0], [1], [0, 0, 1, 1], [], []>} : vector<8x8xbf16>, vector<8x16xbf16>, vector<8x16xf32> -> vector<8x16xf32>
    %43 = arith.addf %37, %42 : vector<8x16xf32>
    %c0_29 = arith.constant 0 : index
    %c0_30 = arith.constant 0 : index
    %44 = vector.load %arg10[%c0_29, %c0_30] : memref<8x16xf32, #tpu.memory_space<vmem>>, vector<8x16xf32>
    tpu.vector_store %arg10[%c0_29, %c0_30], %43 {strides = array<i32>} : memref<8x16xf32, #tpu.memory_space<vmem>>, vector<8x16xf32>,
    %c0_31 = arith.constant 0 : index
    %c0_32 = arith.constant 0 : index
    %45 = vector.load %arg8[%c0_31, %c0_32] : memref<8x1xf32, #tpu.memory_space<vmem>>, vector<8x1xf32>
    tpu.vector_store %arg8[%c0_31, %c0_32], %23 {strides = array<i32>} : memref<8x1xf32, #tpu.memory_space<vmem>>, vector<8x1xf32>,
    %c0_i32_33 = arith.constant 0 : i32
    %46 = arith.cmpi eq, %arg3, %c0_i32_33 : i32
    %47 = arith.extui %46 : i1 to i32
    %c0_i32_34 = arith.constant 0 : i32
    %48 = arith.cmpi ne, %47, %c0_i32_34 : i32
    scf.if %48 {
      %c0_35 = arith.constant 0 : index
      %c0_36 = arith.constant 0 : index
      %49 = vector.load %arg10[%c0_35, %c0_36] : memref<8x16xf32, #tpu.memory_space<vmem>>, vector<8x16xf32>
      %c0_37 = arith.constant 0 : index
      %c0_38 = arith.constant 0 : index
      %50 = vector.load %arg9[%c0_37, %c0_38] : memref<8x1xf32, #tpu.memory_space<vmem>>, vector<8x1xf32>
      %51 = tpu.reciprocal %50 {approx = true} : vector<8x1xf32> -> vector<8x1xf32>
      %52 = vector.broadcast %51 : vector<8x1xf32> to vector<8x16xf32>
      %53 = arith.mulf %49, %52 : vector<8x16xf32>
      %c0_39 = arith.constant 0 : index
      %c0_40 = arith.constant 0 : index
      %c0_41 = arith.constant 0 : index
      %c0_42 = arith.constant 0 : index
      %54 = vector.load %arg7[%c0_39, %c0_40, %c0_41, %c0_42] : memref<1x1x8x16xf32, #tpu.memory_space<vmem>>, vector<1x1x8x16xf32>
      %55 = vector.shape_cast %54 : vector<1x1x8x16xf32> to vector<8x16xf32>
      %56 = vector.shape_cast %53 : vector<8x16xf32> to vector<1x1x8x16xf32>
      tpu.vector_store %arg7[%c0_39, %c0_40, %c0_41, %c0_42], %56 {strides = array<i32>} : memref<1x1x8x16xf32, #tpu.memory_space<vmem>>, vector<1x1x8x16xf32>,
    } else {
    }
    return
  }
  func.func @transform_0(%arg0: i32, %arg1: i32, %arg2: i32, %arg3: i32) -> (i32, i32, i32, i32, i32) {
    %c0_i32 = arith.constant 0 : i32
    %c0_i32_0 = arith.constant 0 : i32
    %c0_i32_1 = arith.constant 0 : i32
    return %c0_i32, %arg0, %arg1, %arg2, %c0_i32_0 : i32, i32, i32, i32, i32
  }
  func.func @transform_1(%arg0: i32, %arg1: i32, %arg2: i32, %arg3: i32) -> (i32, i32, i32, i32, i32) {
    %c0_i32 = arith.constant 0 : i32
    %c0_i32_0 = arith.constant 0 : i32
    %c0_i32_1 = arith.constant 0 : i32
    return %c0_i32, %arg0, %arg1, %arg3, %c0_i32_0 : i32, i32, i32, i32, i32
  }
  func.func @transform_2(%arg0: i32, %arg1: i32, %arg2: i32, %arg3: i32) -> (i32, i32, i32, i32, i32) {
    %c1_i32 = arith.constant 1 : i32
    %c0_i32 = arith.constant 0 : i32
    %c0_i32_0 = arith.constant 0 : i32
    return %c1_i32, %arg0, %arg1, %arg3, %c0_i32 : i32, i32, i32, i32, i32
  }
  func.func @transform_3(%arg0: i32, %arg1: i32, %arg2: i32, %arg3: i32) -> (i32, i32, i32, i32) {
    %c0_i32 = arith.constant 0 : i32
    %c0_i32_0 = arith.constant 0 : i32
    return %arg0, %arg1, %arg2, %c0_i32 : i32, i32, i32, i32
  }
}

module attributes {stable_mosaic.version = 11 : i64} {
  func.func @_linear_kernel(%arg0: i32, %arg1: i32, %arg2: i32, %arg3: memref<16x32xf32, #tpu.memory_space<vmem>>, %arg4: memref<32x64xf32, #tpu.memory_space<vmem>>, %arg5: memref<1x64xf32, #tpu.memory_space<vmem>>, %arg6: memref<16x64xf32, #tpu.memory_space<vmem>>) attributes {dimension_semantics = [#tpu.dimension_semantics<parallel>, #tpu.dimension_semantics<parallel>, #tpu.dimension_semantics<arbitrary>], iteration_bounds = array<i64: 1, 1, 1>, scalar_prefetch = 0 : i64, scratch_operands = 0 : i64, tpu.core_type = #tpu.core_type<tc>, window_params = [{transform_indices = @transform_0, window_bounds = array<i64: 16, 32>}, {transform_indices = @transform_1, window_bounds = array<i64: 32, 64>}, {transform_indices = @transform_2, window_bounds = array<i64: 1, 64>}, {transform_indices = @transform_3, window_bounds = array<i64: 16, 64>}]} {
    %c0 = arith.constant 0 : index
    %c0_0 = arith.constant 0 : index
    %0 = vector.load %arg3[%c0, %c0_0] : memref<16x32xf32, #tpu.memory_space<vmem>>, vector<16x32xf32>
    %1 = arith.truncf %0 : vector<16x32xf32> to vector<16x32xbf16>
    %c0_1 = arith.constant 0 : index
    %c0_2 = arith.constant 0 : index
    %2 = vector.load %arg4[%c0_1, %c0_2] : memref<32x64xf32, #tpu.memory_space<vmem>>, vector<32x64xf32>
    %3 = arith.truncf %2 : vector<32x64xf32> to vector<32x64xbf16>
    %cst = arith.constant dense<0.000000e+00> : vector<16x64xf32>
    %4 = tpu.matmul %1, %3, %cst {dimension_numbers = #tpu.dot_dimension_numbers<[1], [0], [0], [1], [0, 0, 1, 1], [], []>} : vector<16x32xbf16>, vector<32x64xbf16>, vector<16x64xf32> -> vector<16x64xf32>
    %c0_3 = arith.constant 0 : index
    %c0_4 = arith.constant 0 : index
    %5 = vector.load %arg5[%c0_3, %c0_4] : memref<1x64xf32, #tpu.memory_space<vmem>>, vector<1x64xf32>
    %6 = vector.broadcast %5 : vector<1x64xf32> to vector<16x64xf32>
    %7 = arith.addf %4, %6 : vector<16x64xf32>
    %c0_5 = arith.constant 0 : index
    %c0_6 = arith.constant 0 : index
    %8 = vector.load %arg6[%c0_5, %c0_6] : memref<16x64xf32, #tpu.memory_space<vmem>>, vector<16x64xf32>
    tpu.vector_store %arg6[%c0_5, %c0_6], %7 {strides = array<i32>} : memref<16x64xf32, #tpu.memory_space<vmem>>, vector<16x64xf32>,
    return
  }
  func.func @transform_0(%arg0: i32, %arg1: i32, %arg2: i32) -> (i32, i32) {
    %c0_i32 = arith.constant 0 : i32
    return %arg0, %arg2 : i32, i32
  }
  func.func @transform_1(%arg0: i32, %arg1: i32, %arg2: i32) -> (i32, i32) {
    %c0_i32 = arith.constant 0 : i32
    return %arg2, %arg1 : i32, i32
  }
  func.func @transform_2(%arg0: i32, %arg1: i32, %arg2: i32) -> (i32, i32) {
    %c0_i32 = arith.constant 0 : i32
    %c0_i32_0 = arith.constant 0 : i32
    return %c0_i32, %arg1 : i32, i32
  }
  func.func @transform_3(%arg0: i32, %arg1: i32, %arg2: i32) -> (i32, i32) {
    %c0_i32 = arith.constant 0 : i32
    return %arg0, %arg1 : i32, i32
  }
}

</mosaic_0001>

<bundles_post_ra>
// kernel: transformer_forward.33
= control target key start
LH: loop header
LB: loop body
LE: loop exit
PB: predicated region body
PF: predicated region fallthrough
CT: control target
= control target key end

     0   :  { %vm28_vm0 = vcmask 261120   ;;  %vm46_vm1 = vcmask 785408   ;;  %s102_s1 = inlined_call_operand.vmem [shape: f32[32,96], index: 1, kind: input, shape index: {}]   ;;  %s103_s0 = inlined_call_operand.vmem [shape: f32[16,32], index: 0, kind: input, shape index: {}]   ;;  %s104_s2 = inlined_call_operand.vmem [shape: f32[1,96], index: 2, kind: input, shape index: {}]   ;;  %s105_s3 = inlined_call_operand.vmem [shape: f32[16,96], index: 3, kind: output, shape index: {}]  }
   0x1   :  { %v20_v0 = vld [vmem:[%s102_s1 + $0x10] sm:$0xff]  ;;  %v21_v1 = vld [vmem:[%s102_s1 + $0x18] sm:$0xff]  ;;  %v18_v2 = vld [vmem:[%s102_s1] sm:$0xff] }
   0x2   :  { %v23_v3 = vpack.c.bf16 %v21_v1, %v20_v0  ;;  %v19_v4 = vld [vmem:[%s102_s1 + $0x8] sm:$0xff]  ;;  %v15_v6 = vld [vmem:[%s103_s0] sm:$0xff] }
   0x3   :  { %v22_v5 = vpack.c.bf16 %v19_v4, %v18_v2  ;;  %v16_v7 = vld [vmem:[%s103_s0 + $0x8] sm:$0xff]  ;;  %v54_v9 = vld [vmem:[%s104_s2] ss:$0 sm:$0xff] }
   0x4   :  { %38 = vmatpush.bf16.msra.mxu0 %v23_v3  ;;  %v17_v8 = vpack.c.bf16 %v16_v7, %v15_v6 }
   0x8   :  { %39 = vmatpush.bf16.msra.mxu0 %v22_v5 }
   0xb   :  { %53 = vmatmul.msk.bf16.vlgmr.msra.gmra.mxu0 %vm28_vm0, %v17_v8 }
  0x88   :  { %v41_v10 = vpop.f32.mrf.mxu0 }
  0x89   :  { %v42_v11 = vadd.f32 %v54_v9, %v41_v10 }
  0x8b   :  { %47 = vst.msk [vmem:[%s105_s3] sm:$0xff] %vm46_vm1, %v42_v11 }
  0x90   :  { %v43_v12 = vpop.f32.mrf.mxu0 }
  0x91   :  { %v44_v13 = vadd.f32 %v54_v9, %v43_v12 }
  0x93   :  { %48 = vst.msk [vmem:[%s105_s3 + $0x8] sm:$0xff] %vm46_vm1, %v44_v13 }

// kernel: transformer_forward.36
= control target key start
LH: loop header
LB: loop body
LE: loop exit
PB: predicated region body
PF: predicated region fallthrough
CT: control target
= control target key end

     0   :  { %vm28_vm0 = vcmask 261120   ;;  %s101_s1 = inlined_call_operand.vmem [shape: f32[32,32], index: 1, kind: input, shape index: {}]   ;;  %s102_s0 = inlined_call_operand.vmem [shape: f32[16,32], index: 0, kind: input, shape index: {}]   ;;  %s103_s2 = inlined_call_operand.vmem [shape: f32[1,32], index: 2, kind: input, shape index: {}]   ;;  %s104_s3 = inlined_call_operand.vmem [shape: f32[16,32], index: 3, kind: output, shape index: {}]  }
   0x1   :  { %v20_v0 = vld [vmem:[%s101_s1 + $0x10] sm:$0xff]  ;;  %v21_v1 = vld [vmem:[%s101_s1 + $0x18] sm:$0xff]  ;;  %v18_v2 = vld [vmem:[%s101_s1] sm:$0xff] }
   0x2   :  { %v23_v3 = vpack.c.bf16 %v21_v1, %v20_v0  ;;  %v19_v4 = vld [vmem:[%s101_s1 + $0x8] sm:$0xff]  ;;  %v15_v6 = vld [vmem:[%s102_s0] sm:$0xff] }
   0x3   :  { %v22_v5 = vpack.c.bf16 %v19_v4, %v18_v2  ;;  %v16_v7 = vld [vmem:[%s102_s0 + $0x8] sm:$0xff]  ;;  %v53_v9 = vld [vmem:[%s103_s2] ss:$0 sm:$0xff] }
   0x4   :  { %38 = vmatpush.bf16.msra.mxu0 %v23_v3  ;;  %v17_v8 = vpack.c.bf16 %v16_v7, %v15_v6 }
   0x8   :  { %39 = vmatpush.bf16.msra.mxu0 %v22_v5 }
   0xb   :  { %52 = vmatmul.msk.bf16.vlgmr.msra.gmra.mxu0 %vm28_vm0, %v17_v8 }
  0x88   :  { %v41_v10 = vpop.f32.mrf.mxu0 }
  0x89   :  { %v42_v11 = vadd.f32 %v53_v9, %v41_v10 }
  0x8b   :  { %46 = vst.msk [vmem:[%s104_s3] sm:$0xff] %vm28_vm0, %v42_v11 }
  0x90   :  { %v43_v12 = vpop.f32.mrf.mxu0 }
  0x91   :  { %v44_v13 = vadd.f32 %v53_v9, %v43_v12 }
  0x93   :  { %47 = vst.msk [vmem:[%s104_s3 + $0x8] sm:$0xff] %vm28_vm0, %v44_v13 }

// kernel: transformer_forward.35
= control target key start
LH: loop header
LB: loop body
LE: loop exit
PB: predicated region body
PF: predicated region fallthrough
CT: control target
= control target key end

     0   :  { %vm37_vm0 = vcmask 261120   ;;  %v139_v20 = vmov 32.0   ;;  %s221_s1 = inlined_call_operand.vmem [shape: f32[32,32], index: 1, kind: input, shape index: {}]   ;;  %s222_s0 = inlined_call_operand.vmem [shape: f32[16,32], index: 0, kind: input, shape index: {}]   ;;  %s223_s2 = inlined_call_operand.vmem [shape: f32[1,32], index: 2, kind: input, shape index: {}]   ;;  %s224_s3 = inlined_call_operand.vmem [shape: f32[16,32], index: 3, kind: input, shape index: {}]   ;;  %s225_s4 = inlined_call_operand.vmem [shape: f32[1,32], index: 4, kind: input, shape index: {}]   ;;  %s226_s5 = inlined_call_operand.vmem [shape: f32[1,32], index: 5, kind: input, shape index: {}]   ;;  %s227_s6 = inlined_call_operand.vmem [shape: f32[16,32], index: 6, kind: output, shape index: {}]  }
   0x1   :  { %v29_v0 = vld [vmem:[%s221_s1 + $0x10] sm:$0xff]  ;;  %v30_v1 = vld [vmem:[%s221_s1 + $0x18] sm:$0xff]  ;;  %v27_v2 = vld [vmem:[%s221_s1] sm:$0xff]  ;;  %133 = vrcp.f32 %v139_v20 }
   0x2   :  { %v32_v3 = vpack.c.bf16 %v30_v1, %v29_v0  ;;  %v28_v4 = vld [vmem:[%s221_s1 + $0x8] sm:$0xff]  ;;  %v24_v6 = vld [vmem:[%s222_s0] sm:$0xff] }
   0x3   :  { %v31_v5 = vpack.c.bf16 %v28_v4, %v27_v2  ;;  %v25_v7 = vld [vmem:[%s222_s0 + $0x8] sm:$0xff]  ;;  %v130_v9 = vld [vmem:[%s223_s2] ss:$0 sm:$0xff] }
   0x4   :  { %47 = vmatpush.bf16.msra.mxu0 %v32_v3  ;;  %v26_v8 = vpack.c.bf16 %v25_v7, %v24_v6  ;;  %v55_v11 = vld [vmem:[%s224_s3] sm:$0xff]  ;;  %v56_v16 = vld [vmem:[%s224_s3 + $0x8] sm:$0xff] }
   0x5   :  { %v131_v51 = vld [vmem:[%s225_s4] ss:$0 sm:$0xff] }
   0x6   :  { %v132_v54 = vld [vmem:[%s226_s5] ss:$0 sm:$0xff] }
   0x7   :  { %v134_v21 = vpop.eup %133 }
   0x8   :  { %48 = vmatpush.bf16.msra.mxu0 %v31_v5  ;;  %v66_v22 = vmul.f32 32.0, %v134_v21  ;;  %vm70_vm1 = vweird.f32 %v134_v21 }
   0xa   :  { %v67_v23 = vsub.f32 1.0, %v66_v22 }
   0xb   :  { %128 = vmatmul.msk.bf16.vlgmr.msra.gmra.mxu0 %vm37_vm0, %v26_v8 }
   0xc   :  { %v68_v24 = vmul.f32 %v134_v21, %v67_v23 }
   0xe   :  { %v69_v25 = vadd.f32 %v134_v21, %v68_v24 }
  0x10   :  { %v71_v26 = vsel %vm70_vm1, %v134_v21, %v69_v25 }
  0x88   :  { %v50_v10 = vpop.f32.mrf.mxu0 }
  0x89   :  { %v51_v12 = vadd.f32 %v130_v9, %v50_v10 }
  0x8b   :  { %v57_v13 = vadd.f32 %v55_v11, %v51_v12 }
  0x8d   :  { %v59_v14 = vsel %vm37_vm0, %v57_v13, 0.0 }
  0x8e   :  { %60 = vadd.xlane.f32.xlu0 %v59_v14 }
  0x90   :  { %v52_v15 = vpop.f32.mrf.mxu0 }
  0x91   :  { %v53_v17 = vadd.f32 %v130_v9, %v52_v15 }
  0x93   :  { %v58_v18 = vadd.f32 %v56_v16, %v53_v17 }
  0x95   :  { %v62_v19 = vsel %vm37_vm0, %v58_v18, 0.0 }
  0x96   :  { %63 = vadd.xlane.f32.xlu0 %v62_v19 }
 0x101   :  { %v61_v27 = vpop.xlane.xlu0 %60 }
 0x102   :  { %v72_v28 = vmul.f32 %v71_v26, %v61_v27 }
 0x104   :  { %v74_v29 = vsub.f32 %v57_v13, %v72_v28 }
 0x106   :  { %v76_v30 = vmul.f32 %v74_v29, %v74_v29 }
 0x108   :  { %v78_v31 = vsel %vm37_vm0, %v76_v30, 0.0 }
 0x109   :  { %79 = vadd.xlane.f32.xlu1 %v78_v31  ;;  %v64_v32 = vpop.xlane.xlu0 %63 }
 0x10a   :  { %v73_v33 = vmul.f32 %v71_v26, %v64_v32 }
 0x10c   :  { %v75_v34 = vsub.f32 %v58_v18, %v73_v33 }
 0x10e   :  { %v77_v35 = vmul.f32 %v75_v34, %v75_v34 }
 0x110   :  { %v81_v36 = vsel %vm37_vm0, %v77_v35, 0.0 }
 0x111   :  { %82 = vadd.xlane.f32.xlu1 %v81_v36 }
 0x17c   :  { %v80_v37 = vpop.xlane.xlu1 %79 }
 0x17d   :  { %v84_v38 = vmul.f32 %v80_v37, %v71_v26 }
 0x17f   :  { %v86_v39 = vadd.f32 1e-05, %v84_v38 }
 0x181   :  { %135 = vrsqrt.f32 %v86_v39  ;;  %vm94_vm3 = vweird.f32 %v86_v39 }
 0x184   :  { %v83_v40 = vpop.xlane.xlu1 %82 }
 0x185   :  { %v85_v41 = vmul.f32 %v83_v40, %v71_v26 }
 0x187   :  { %v136_v42 = vpop.eup %135  ;;  %v87_v43 = vadd.f32 1e-05, %v85_v41 }
 0x188   :  { %v89_v44 = vmul.f32 %v136_v42, %v86_v39  ;;  %vm95_vm2 = vweird.f32 %v136_v42 }
 0x189   :  { %137 = vrsqrt.f32 %v87_v43  ;;  %vm96_vm4 = vmor %vm94_vm3, %vm95_vm2  ;;  %vm104_vm6 = vweird.f32 %v87_v43 }
 0x18a   :  { %v90_v45 = vmul.f32 %v136_v42, %v89_v44 }
 0x18c   :  { %v91_v46 = vmul.f32 0.5, %v90_v45 }
 0x18e   :  { %v92_v47 = vsub.f32 1.5, %v91_v46 }
 0x18f   :  { %v138_v48 = vpop.eup %137 }
 0x190   :  { %v93_v49 = vmul.f32 %v136_v42, %v92_v47  ;;  %v99_v50 = vmul.f32 %v138_v48, %v87_v43  ;;  %vm105_vm5 = vweird.f32 %v138_v48 }
 0x191   :  { %vm106_vm7 = vmor %vm104_vm6, %vm105_vm5 }
 0x192   :  { %v97_v52 = vsel %vm96_vm4, %v136_v42, %v93_v49  ;;  %v100_v53 = vmul.f32 %v138_v48, %v99_v50 }
 0x193   :  { %v108_v55 = vmul.f32 %v97_v52, %v74_v29 }
 0x194   :  { %v101_v56 = vmul.f32 0.5, %v100_v53 }
 0x195   :  { %v114_v57 = vmul.f32 %v131_v51, %v108_v55 }
 0x196   :  { %v102_v58 = vsub.f32 1.5, %v101_v56 }
 0x197   :  { %v120_v59 = vadd.f32 %v132_v54, %v114_v57 }
 0x198   :  { %v103_v60 = vmul.f32 %v138_v48, %v102_v58 }
 0x199   :  { %122 = vst.msk [vmem:[%s227_s6] sm:$0xff] %vm37_vm0, %v120_v59 }
 0x19a   :  { %v107_v61 = vsel %vm106_vm7, %v138_v48, %v103_v60 }
 0x19b   :  { %v109_v62 = vmul.f32 %v107_v61, %v75_v34 }
 0x19d   :  { %v115_v63 = vmul.f32 %v131_v51, %v109_v62 }
 0x19f   :  { %v121_v0 = vadd.f32 %v132_v54, %v115_v63 }
 0x1a1   :  { %123 = vst.msk [vmem:[%s227_s6 + $0x8] sm:$0xff] %vm37_vm0, %v121_v0 }

// kernel: transformer_forward.34
= control target key start
LH: loop header
LB: loop body
LE: loop exit
PB: predicated region body
PF: predicated region fallthrough
CT: control target
= control target key end

     0   :  { %s738_s12 = smov 0   ;;  %s740_s13 = smov 0   ;;  %s813_s0 = inlined_call_operand.vmem [shape: f32[3,2,2,8,16], index: 0, kind: input, shape index: {}, may-alias: {0,1,2}]   ;;  %s814_s1 = inlined_call_operand.vmem [shape: f32[3,2,2,8,16], index: 1, kind: input, shape index: {}, may-alias: {0,1,2}]   ;;  %s815_s2 = inlined_call_operand.vmem [shape: f32[3,2,2,8,16], index: 2, kind: input, shape index: {}, may-alias: {0,1,2}]   ;;  %s816_s3 = inlined_call_operand.vmem [shape: f32[2,2,8,16], index: 3, kind: output, shape index: {}]  }
   0x1   :  { %s742_s14 = smov 0   ;;  %s744_s15 = smov 0  }
   0x2   :  { %s746_s16 = smov 0  }
   0x3 LB: > { %s35_s17 = sadd.s32 1, %s705_s14  ;;  %s39_s18 = sadd.s32 1, %s709_s15  ;;  %s713_s16 = sphi %s746_s16, %s13_s16   ;;  %s709_s15 = sphi %s744_s15, %s820_s15   ;;  %s705_s14 = sphi %s742_s14, %s819_s14   ;;  %s701_s13 = sphi %s740_s13, %s818_s13   ;;  %s697_s12 = sphi %s738_s12, %s817_s12  }
   0x4   : > { %p37_p0 = scmp.ge.s32.totalorder %s35_s17, 2  ;;  %p608_p1 = scmp.ge.s32.totalorder %s713_s16, 1 }
   0x5   : > { %p219_p2 = scmp.lt.s32.totalorder %s713_s16, 5 }
   0x6   : > { %s822_s17 = smov (%p37_p0, %s35_s17), 0  ;;  %s824_s18 = smov (!%p37_p0, %s39_s18), %s709_s15 }
   0x7   : > { %p220_p3 = pnand %p608_p1, %p219_p2  ;;  %p41_p4 = scmp.ge.s32.totalorder %s824_s18, 2 }
   0x8   : > { %p279_p5 = scmp.lt.s32.totalorder (!%p220_p3), %s701_s13, 1  ;;  %p281_p6 = scmp.lt.s32.totalorder (!%p220_p3), %s697_s12, 1 }
   0x9   : > { %s826_s18 = smov (%p41_p4, %s824_s18), 0  ;;  %223 = sbr.rel (%p220_p3) target bundleno = 630 (0x276), region = 32 }
   0xe   : > { %s828_s13 = smov (!%p279_p5, %s701_s13), 1  ;;  %s830_s12 = smov (!%p281_p6, %s697_s12), 1  ;;  %vm333_vm0 = vcmask 130048   ;;  %vm330_vm1 = vcmask 7168   ;;  %v715_v6 = vmov -1e+30   ;;  %v367_v7 = vlaneseq }
   0xf   : > { %s609_s19 = sshll.u32 %s828_s13, 1  ;;  %331 = vst.msk [vmem:[#allocation2] sm:$0xff] %vm330_vm1, %v715_v6  ;;  %vm380_vm5 = vcmask 64512   ;;  %v716_v14 = vmov 0   ;;  %v717_v15 = vmov 0.0   ;;  %vm417_vm6 = vcmask 1043456  }
  0x10   : > { %s287_s20 = sadd.s32 %s609_s19, %s830_s12  ;;  %v368_v8 = vand.u32 127, %v367_v7  ;;  %v373_v9 = vshrl.u32 %v367_v7, 7  ;;  %666 = vset.pattern.permute.xlu0 %v716_v14  ;;  %667 = vset.pattern.permute.xlu1 %v716_v14  ;;  %332 = vst.msk [vmem:[#allocation3] sm:$0xff] %vm330_vm1, %v717_v15 }
  0x11   : > { %s768_s21 = sshll.u32 %s287_s20, 3  ;;  %668 = vset.pattern.permute.xlu2 %v716_v14  ;;  %334 = vst.msk [vmem:[#allocation4] sm:$0xff] %vm333_vm0, %v717_v15 }
  0x12   : > { %s532_s24 = scalar_lea.vmem %s814_s1, %s768_s21  ;;  %s289_s27 = scalar_lea.vmem %s813_s0, %s768_s21  ;;  %vm371_vm2 = vcmp.lt.s32.totalorder %v368_v8, 8  ;;  %vm376_vm3 = vcmp.le.s32.totalorder %v368_v8, %v373_v9 }
  0x13   : > { %v617_v0 = vld [vmem:[%s532_s24 + $0x20] sm:$0xff]  ;;  %vm377_vm4 = vmand %vm371_vm2, %vm376_vm3  ;;  %s538_s30 = scalar_lea.vmem %s815_s2, %s768_s21  ;;  %s324_s6 = scalar_lea.vmem %s816_s3, %s768_s21 }
  0x14   : > { %v342_v1 = vld [vmem:[%s289_s27] sm:$0xff]  ;;  %v346_v2 = vpack.c.bf16 %v617_v0, %v617_v0 }
  0x15   : > { %v343_v4 = vmul.f32 0.25, %v342_v1  ;;  %v619_v20 = vld [vmem:[%s538_s30 + $0x40] sm:$0xff] }
  0x16   : > { %v352_v3 = vsel %vm333_vm0, %v346_v2, 0  ;;  %v379_v16 = vld [vmem:[#allocation2] sm:$0xff]  ;;  %v413_v21 = vpack.c.bf16 %v619_v20, %v619_v20 }
  0x17   : > { %361 = vmatpush.bf16.xpose.msra.mxu0 %v352_v3  ;;  %v344_v5 = vpack.c.bf16 %v343_v4, %v343_v4  ;;  %v396_v31 = vld [vmem:[#allocation3] sm:$0xff] }
  0x18   : > { %v419_v22 = vsel %vm417_vm6, %v413_v21, 0  ;;  %v404_v39 = vld [vmem:[#allocation4] sm:$0xff] }
  0x19   : > { %428 = vmatpush.bf16.msra.mxu1 %v419_v22 }
  0x1e   : > { %618 = vmatmul.msk.bf16.vlgmr.msra.gmra.mxu0 %vm333_vm0, %v344_v5 }
  0x9b   : > { %v363_v10 = vpop.f32.mrf.mxu0 }
  0x9c   : > { %v378_v11 = vsel %vm377_vm4, %v363_v10, -1e+30 }
  0x9d   : > { %v381_v12 = vsel %vm380_vm5, %v378_v11, -inf }
  0x9e   : > { %382 = vmax.xlane.f32.xlu0 %v381_v12 }
  0xa3   : > { %v365_v13 = vpop.f32.mrf.mxu0 }
 0x111   : > { %v383_v17 = vpop.xlane.xlu0 %382 }
 0x112   : > { %v384_v18 = vmax.f32 %v379_v16, %v383_v17 }
 0x114   : > { %v385_v19 = vsub.f32 %v379_v16, %v384_v18  ;;  %436 = vst.msk [vmem:[#allocation2] sm:$0xff] %vm330_vm1, %v384_v18  ;;  %390 = vperm.xlu0 %666, %v384_v18  }
 0x116   : > { %v386_v29 = vmul.f32 1.442695, %v385_v19 }
 0x186   : > { %v391_v23 = vpop.permute.xlu0 %390 }
 0x187   : > { %v393_v24 = vsub.f32 %v378_v11, %v391_v23 }
 0x189   : > { %v394_v25 = vmul.f32 1.442695, %v393_v24 }
 0x18b   : > { %669 = vpow2.f32 %v394_v25 }
 0x18c   : > { %671 = vpow2.f32 %v386_v29 }
 0x191   : > { %v670_v26 = vpop.eup %669 }
 0x192   : > { %v398_v27 = vsel %vm380_vm5, %v670_v26, 0.0  ;;  %v411_v28 = vpack.c.bf16 %v670_v26, %v670_v26  ;;  %v672_v30 = vpop.eup %671 }
 0x193   : > { %399 = vadd.xlane.f32.xlu1 %v398_v27  ;;  %v397_v32 = vmul.f32 %v672_v30, %v396_v31 }
 0x194   : > { %620 = vmatmul.msk.bf16.vlgmr.msra.gmra.mxu1 %vm380_vm5, %v411_v28 }
 0x1ac   : > { %407 = vperm.xlu1 %667, %v672_v30  }
 0x206   : > { %v400_v33 = vpop.xlane.xlu1 %399 }
 0x207   : > { %v401_v34 = vadd.f32 %v400_v33, %v397_v32 }
 0x209   : > { %403 = vst.msk [vmem:[#allocation3] sm:$0xff] %vm330_vm1, %v401_v34 }
 0x210   : > { %v441_v35 = vld [vmem:[#allocation3] sm:$0xff] }
 0x211   : > { %v430_v36 = vpop.f32.mrf.mxu1  ;;  %673 = vrcp.f32 %v441_v35 }
 0x217   : > { %v674_v37 = vpop.eup %673 }
 0x218   : > { %445 = vperm.xlu2 %668, %v674_v37  }
 0x219   : > { %v432_v38 = vpop.f32.mrf.mxu1 }
 0x21e   : > { %v408_v40 = vpop.permute.xlu1 %407 }
 0x21f   : > { %v410_v41 = vmul.f32 %v408_v40, %v404_v39 }
 0x221   : > { %v434_v42 = vadd.f32 %v430_v36, %v410_v41 }
 0x223   : > { %435 = vst.msk [vmem:[#allocation4] sm:$0xff] %vm333_vm0, %v434_v42 }
 0x22a   : > { %v440_v43 = vld [vmem:[#allocation4] sm:$0xff] }
 0x272   : > { %v446_v44 = vpop.permute.xlu2 %445 }
 0x273   : > { %v448_v45 = vmul.f32 %v446_v44, %v440_v43 }
 0x275   : > { %450 = vst.msk [vmem:[%s324_s6] sm:$0xff] %vm333_vm0, %v448_v45 }
 0x276 PF: > { %s13_s16 = sadd.s32 1, %s713_s16   ;;  %s817_s12 = smov %s705_s14 }
 0x277   : > { %p10_p7 = scmp.ge.s32.totalorder %s13_s16, 6   ;;  %s818_s13 = smov %s709_s15 }
 0x278   : > { %s819_s14 = smov %s822_s17  ;;  %s820_s15 = smov %s826_s18 }
 0x279   :  { %12 = sbr.rel (!%p10_p7) target bundleno = 3 (0x3), region = 80 }

// kernel: transformer_forward.37
= control target key start
LH: loop header
LB: loop body
LE: loop exit
PB: predicated region body
PF: predicated region fallthrough
CT: control target
= control target key end

     0   :  { %vm28_vm0 = vcmask 261120   ;;  %vm46_vm1 = vcmask 523264   ;;  %s102_s1 = inlined_call_operand.vmem [shape: f32[32,64], index: 1, kind: input, shape index: {}]   ;;  %s103_s0 = inlined_call_operand.vmem [shape: f32[16,32], index: 0, kind: input, shape index: {}]   ;;  %s104_s2 = inlined_call_operand.vmem [shape: f32[1,64], index: 2, kind: input, shape index: {}]   ;;  %s105_s3 = inlined_call_operand.vmem [shape: f32[16,64], index: 3, kind: output, shape index: {}]  }
   0x1   :  { %v20_v0 = vld [vmem:[%s102_s1 + $0x10] sm:$0xff]  ;;  %v21_v1 = vld [vmem:[%s102_s1 + $0x18] sm:$0xff]  ;;  %v18_v2 = vld [vmem:[%s102_s1] sm:$0xff] }
   0x2   :  { %v23_v3 = vpack.c.bf16 %v21_v1, %v20_v0  ;;  %v19_v4 = vld [vmem:[%s102_s1 + $0x8] sm:$0xff]  ;;  %v15_v6 = vld [vmem:[%s103_s0] sm:$0xff] }
   0x3   :  { %v22_v5 = vpack.c.bf16 %v19_v4, %v18_v2  ;;  %v16_v7 = vld [vmem:[%s103_s0 + $0x8] sm:$0xff]  ;;  %v54_v9 = vld [vmem:[%s104_s2] ss:$0 sm:$0xff] }
   0x4   :  { %38 = vmatpush.bf16.msra.mxu0 %v23_v3  ;;  %v17_v8 = vpack.c.bf16 %v16_v7, %v15_v6 }
   0x8   :  { %39 = vmatpush.bf16.msra.mxu0 %v22_v5 }
   0xb   :  { %53 = vmatmul.msk.bf16.vlgmr.msra.gmra.mxu0 %vm28_vm0, %v17_v8 }
  0x88   :  { %v41_v10 = vpop.f32.mrf.mxu0 }
  0x89   :  { %v42_v11 = vadd.f32 %v54_v9, %v41_v10 }
  0x8b   :  { %47 = vst.msk [vmem:[%s105_s3] sm:$0xff] %vm46_vm1, %v42_v11 }
  0x90   :  { %v43_v12 = vpop.f32.mrf.mxu0 }
  0x91   :  { %v44_v13 = vadd.f32 %v54_v9, %v43_v12 }
  0x93   :  { %48 = vst.msk [vmem:[%s105_s3 + $0x8] sm:$0xff] %vm46_vm1, %v44_v13 }

// kernel: transformer_forward.28
= control target key start
LH: loop header
LB: loop body
LE: loop exit
PB: predicated region body
PF: predicated region fallthrough
CT: control target
= control target key end

     0   :  { %vm43_vm0 = vcmask 261120   ;;  %vm80_vm1 = vcmask 523264   ;;  %v184_v40 = vmov 32.0   ;;  %s303_s1 = inlined_call_operand.vmem [shape: f32[32,64], index: 1, kind: input, shape index: {}]   ;;  %s304_s0 = inlined_call_operand.vmem [shape: f32[16,32], index: 0, kind: input, shape index: {}, may-alias: {0,5}]   ;;  %s305_s2 = inlined_call_operand.vmem [shape: f32[1,64], index: 2, kind: input, shape index: {}]   ;;  %s306_s4 = inlined_call_operand.vmem [shape: f32[1,32], index: 4, kind: input, shape index: {}]   ;;  %s307_s3 = inlined_call_operand.vmem [shape: f32[64,32], index: 3, kind: input, shape index: {}]   ;;  %s308_s5 = inlined_call_operand.vmem [shape: f32[16,32], index: 5, kind: input, shape index: {}, may-alias: {0,5}]   ;;  %s309_s6 = inlined_call_operand.vmem [shape: f32[1,32], index: 6, kind: input, shape index: {}]   ;;  %s310_s7 = inlined_call_operand.vmem [shape: f32[1,32], index: 7, kind: input, shape index: {}]   ;;  %s311_s8 = inlined_call_operand.vmem [shape: f32[16,32], index: 8, kind: output, shape index: {}]  }
   0x1   :  { %v35_v0 = vld [vmem:[%s303_s1 + $0x10] sm:$0xff]  ;;  %v36_v1 = vld [vmem:[%s303_s1 + $0x18] sm:$0xff]  ;;  %v33_v2 = vld [vmem:[%s303_s1] sm:$0xff]  ;;  %178 = vrcp.f32 %v184_v40 }
   0x2   :  { %v38_v3 = vpack.c.bf16 %v36_v1, %v35_v0  ;;  %v34_v4 = vld [vmem:[%s303_s1 + $0x8] sm:$0xff]  ;;  %v30_v6 = vld [vmem:[%s304_s0] sm:$0xff]  ;;  %v70_v9 = vld [vmem:[%s307_s3 + $0x30] sm:$0xff] }
   0x3   :  { %v37_v5 = vpack.c.bf16 %v34_v4, %v33_v2  ;;  %v31_v7 = vld [vmem:[%s304_s0 + $0x8] sm:$0xff]  ;;  %v71_v10 = vld [vmem:[%s307_s3 + $0x38] sm:$0xff]  ;;  %v68_v12 = vld [vmem:[%s307_s3 + $0x20] sm:$0xff] }
   0x4   :  { %53 = vmatpush.bf16.msra.mxu0 %v38_v3  ;;  %v32_v8 = vpack.c.bf16 %v31_v7, %v30_v6  ;;  %v75_v11 = vpack.c.bf16 %v71_v10, %v70_v9  ;;  %v69_v13 = vld [vmem:[%s307_s3 + $0x28] sm:$0xff]  ;;  %v66_v15 = vld [vmem:[%s307_s3 + $0x10] sm:$0xff]  ;;  %v67_v16 = vld [vmem:[%s307_s3 + $0x18] sm:$0xff] }
   0x5   :  { %v74_v14 = vpack.c.bf16 %v69_v13, %v68_v12  ;;  %v73_v17 = vpack.c.bf16 %v67_v16, %v66_v15  ;;  %v64_v18 = vld [vmem:[%s307_s3] sm:$0xff]  ;;  %v65_v19 = vld [vmem:[%s307_s3 + $0x8] sm:$0xff] }
   0x6   :  { %88 = vmatpush.bf16.msra.mxu1 %v75_v11  ;;  %v72_v20 = vpack.c.bf16 %v65_v19, %v64_v18  ;;  %v174_v22 = vld [vmem:[%s305_s2] ss:$0 sm:$0xff]  ;;  %v99_v36 = vld [vmem:[%s308_s5 + $0x8] sm:$0xff] }
   0x7   :  { %v175_v29 = vld [vmem:[%s306_s4] ss:$0 sm:$0xff]  ;;  %v179_v41 = vpop.eup %178 }
   0x8   :  { %54 = vmatpush.bf16.msra.mxu0 %v37_v5  ;;  %v98_v31 = vld [vmem:[%s308_s5] sm:$0xff]  ;;  %v109_v42 = vmul.f32 32.0, %v179_v41  ;;  %vm113_vm2 = vweird.f32 %v179_v41 }
   0x9   :  { %v176_v7 = vld [vmem:[%s309_s6] ss:$0 sm:$0xff] }
   0xa   :  { %89 = vmatpush.bf16.msra.mxu1 %v74_v14  ;;  %v110_v43 = vsub.f32 1.0, %v109_v42  ;;  %v177_v10 = vld [vmem:[%s310_s7] ss:$0 sm:$0xff] }
   0xb   :  { %171 = vmatmul.msk.bf16.vlgmr.msra.gmra.mxu0 %vm43_vm0, %v32_v8 }
   0xc   :  { %v111_v44 = vmul.f32 %v179_v41, %v110_v43 }
   0xe   :  { %90 = vmatpush.bf16.msra.mxu1 %v73_v17  ;;  %v112_v45 = vadd.f32 %v179_v41, %v111_v44 }
  0x10   :  { %v114_v46 = vsel %vm113_vm2, %v179_v41, %v112_v45 }
  0x12   :  { %91 = vmatpush.bf16.msra.mxu1 %v72_v20 }
  0x88   :  { %v56_v21 = vpop.f32.mrf.mxu0 }
  0x89   :  { %v57_v23 = vadd.f32 %v174_v22, %v56_v21 }
  0x8b   :  { %v61_v26 = vmax.f32 %v57_v23, 0.0 }
  0x90   :  { %v58_v24 = vpop.f32.mrf.mxu0 }
  0x91   :  { %v59_v25 = vadd.f32 %v174_v22, %v58_v24 }
  0x93   :  { %v62_v27 = vmax.f32 %v59_v25, 0.0 }
  0x95   :  { %v63_v28 = vpack.c.bf16 %v62_v27, %v61_v26 }
  0x97   :  { %172 = vmatmul.msk.bf16.vlgmr.msra.gmra.mxu1 %vm80_vm1, %v63_v28 }
 0x114   :  { %v93_v30 = vpop.f32.mrf.mxu1 }
 0x115   :  { %v94_v32 = vadd.f32 %v175_v29, %v93_v30 }
 0x117   :  { %v100_v33 = vadd.f32 %v98_v31, %v94_v32 }
 0x119   :  { %v102_v34 = vsel %vm43_vm0, %v100_v33, 0.0 }
 0x11a   :  { %103 = vadd.xlane.f32.xlu0 %v102_v34 }
 0x11c   :  { %v95_v35 = vpop.f32.mrf.mxu1 }
 0x11d   :  { %v96_v37 = vadd.f32 %v175_v29, %v95_v35 }
 0x11f   :  { %v101_v38 = vadd.f32 %v99_v36, %v96_v37 }
 0x121   :  { %v105_v39 = vsel %vm43_vm0, %v101_v38, 0.0 }
 0x122   :  { %106 = vadd.xlane.f32.xlu0 %v105_v39 }
 0x18d   :  { %v104_v47 = vpop.xlane.xlu0 %103 }
 0x18e   :  { %v115_v48 = vmul.f32 %v114_v46, %v104_v47 }
 0x190   :  { %v117_v49 = vsub.f32 %v100_v33, %v115_v48 }
 0x192   :  { %v119_v50 = vmul.f32 %v117_v49, %v117_v49 }
 0x194   :  { %v121_v51 = vsel %vm43_vm0, %v119_v50, 0.0 }
 0x195   :  { %122 = vadd.xlane.f32.xlu1 %v121_v51  ;;  %v107_v52 = vpop.xlane.xlu0 %106 }
 0x196   :  { %v116_v53 = vmul.f32 %v114_v46, %v107_v52 }
 0x198   :  { %v118_v54 = vsub.f32 %v101_v38, %v116_v53 }
 0x19a   :  { %v120_v55 = vmul.f32 %v118_v54, %v118_v54 }
 0x19c   :  { %v124_v56 = vsel %vm43_vm0, %v120_v55, 0.0 }
 0x19d   :  { %125 = vadd.xlane.f32.xlu1 %v124_v56 }
 0x208   :  { %v123_v57 = vpop.xlane.xlu1 %122 }
 0x209   :  { %v127_v58 = vmul.f32 %v123_v57, %v114_v46 }
 0x20b   :  { %v129_v59 = vadd.f32 1e-05, %v127_v58 }
 0x20d   :  { %180 = vrsqrt.f32 %v129_v59  ;;  %vm137_vm4 = vweird.f32 %v129_v59 }
 0x210   :  { %v126_v60 = vpop.xlane.xlu1 %125 }
 0x211   :  { %v128_v61 = vmul.f32 %v126_v60, %v114_v46 }
 0x213   :  { %v181_v62 = vpop.eup %180  ;;  %v130_v63 = vadd.f32 1e-05, %v128_v61 }
 0x214   :  { %v132_v0 = vmul.f32 %v181_v62, %v129_v59  ;;  %vm138_vm3 = vweird.f32 %v181_v62 }
 0x215   :  { %182 = vrsqrt.f32 %v130_v63  ;;  %vm139_vm5 = vmor %vm137_vm4, %vm138_vm3  ;;  %vm147_vm7 = vweird.f32 %v130_v63 }
 0x216   :  { %v133_v1 = vmul.f32 %v181_v62, %v132_v0 }
 0x218   :  { %v134_v2 = vmul.f32 0.5, %v133_v1 }
 0x21a   :  { %v135_v3 = vsub.f32 1.5, %v134_v2 }
 0x21b   :  { %v183_v4 = vpop.eup %182 }
 0x21c   :  { %v136_v5 = vmul.f32 %v181_v62, %v135_v3  ;;  %v142_v6 = vmul.f32 %v183_v4, %v130_v63  ;;  %vm148_vm6 = vweird.f32 %v183_v4 }
 0x21d   :  { %vm149_vm8 = vmor %vm147_vm7, %vm148_vm6 }
 0x21e   :  { %v140_v8 = vsel %vm139_vm5, %v181_v62, %v136_v5  ;;  %v143_v9 = vmul.f32 %v183_v4, %v142_v6 }
 0x21f   :  { %v151_v11 = vmul.f32 %v140_v8, %v117_v49 }
 0x220   :  { %v144_v12 = vmul.f32 0.5, %v143_v9 }
 0x221   :  { %v157_v13 = vmul.f32 %v176_v7, %v151_v11 }
 0x222   :  { %v145_v14 = vsub.f32 1.5, %v144_v12 }
 0x223   :  { %v163_v15 = vadd.f32 %v177_v10, %v157_v13 }
 0x224   :  { %v146_v16 = vmul.f32 %v183_v4, %v145_v14 }
 0x225   :  { %165 = vst.msk [vmem:[%s311_s8] sm:$0xff] %vm43_vm0, %v163_v15 }
 0x226   :  { %v150_v17 = vsel %vm149_vm8, %v183_v4, %v146_v16 }
 0x227   :  { %v152_v18 = vmul.f32 %v150_v17, %v118_v54 }
 0x229   :  { %v158_v19 = vmul.f32 %v176_v7, %v152_v18 }
 0x22b   :  { %v164_v20 = vadd.f32 %v177_v10, %v158_v19 }
 0x22d   :  { %166 = vst.msk [vmem:[%s311_s8 + $0x8] sm:$0xff] %vm43_vm0, %v164_v20 }

// kernel: transformer_forward.26
= control target key start
LH: loop header
LB: loop body
LE: loop exit
PB: predicated region body
PF: predicated region fallthrough
CT: control target
= control target key end

     0   :  { %s725_s12 = smov 0   ;;  %s727_s13 = smov 0   ;;  %s800_s0 = inlined_call_operand.vmem [shape: f32[3,2,2,8,16], index: 0, kind: input, shape index: {}, may-alias: {0,1,2}]   ;;  %s801_s1 = inlined_call_operand.vmem [shape: f32[3,2,2,8,16], index: 1, kind: input, shape index: {}, may-alias: {0,1,2}]   ;;  %s802_s2 = inlined_call_operand.vmem [shape: f32[3,2,2,8,16], index: 2, kind: input, shape index: {}, may-alias: {0,1,2}]   ;;  %s803_s3 = inlined_call_operand.vmem [shape: f32[2,2,8,16], index: 3, kind: output, shape index: {}]  }
   0x1   :  { %s729_s14 = smov 0   ;;  %s731_s15 = smov 0  }
   0x2   :  { %s733_s16 = smov 0  }
   0x3 LB: > { %s35_s17 = sadd.s32 1, %s692_s14  ;;  %s39_s18 = sadd.s32 1, %s696_s15  ;;  %s700_s16 = sphi %s733_s16, %s13_s16   ;;  %s696_s15 = sphi %s731_s15, %s807_s15   ;;  %s692_s14 = sphi %s729_s14, %s806_s14   ;;  %s688_s13 = sphi %s727_s13, %s805_s13   ;;  %s684_s12 = sphi %s725_s12, %s804_s12  }
   0x4   : > { %p37_p0 = scmp.ge.s32.totalorder %s35_s17, 2  ;;  %p595_p1 = scmp.ge.s32.totalorder %s700_s16, 1 }
   0x5   : > { %p219_p2 = scmp.lt.s32.totalorder %s700_s16, 5 }
   0x6   : > { %s809_s17 = smov (%p37_p0, %s35_s17), 0  ;;  %s811_s18 = smov (!%p37_p0, %s39_s18), %s696_s15 }
   0x7   : > { %p220_p3 = pnand %p595_p1, %p219_p2  ;;  %p41_p4 = scmp.ge.s32.totalorder %s811_s18, 2 }
   0x8   : > { %p279_p5 = scmp.lt.s32.totalorder (!%p220_p3), %s688_s13, 1  ;;  %p281_p6 = scmp.lt.s32.totalorder (!%p220_p3), %s684_s12, 1 }
   0x9   : > { %s813_s18 = smov (%p41_p4, %s811_s18), 0  ;;  %223 = sbr.rel (%p220_p3) target bundleno = 630 (0x276), region = 32 }
   0xe   : > { %s815_s13 = smov (!%p279_p5, %s688_s13), 1  ;;  %s817_s12 = smov (!%p281_p6, %s684_s12), 1  ;;  %vm333_vm0 = vcmask 130048   ;;  %vm330_vm1 = vcmask 7168   ;;  %v702_v6 = vmov -1e+30   ;;  %v361_v7 = vlaneseq }
   0xf   : > { %s596_s19 = sshll.u32 %s815_s13, 1  ;;  %331 = vst.msk [vmem:[#allocation2] sm:$0xff] %vm330_vm1, %v702_v6  ;;  %vm368_vm3 = vcmask 64512   ;;  %v703_v13 = vmov 0   ;;  %v704_v14 = vmov 0.0   ;;  %vm405_vm4 = vcmask 1043456  }
  0x10   : > { %s287_s20 = sadd.s32 %s596_s19, %s817_s12  ;;  %v362_v8 = vand.u32 127, %v361_v7  ;;  %653 = vset.pattern.permute.xlu0 %v703_v13  ;;  %654 = vset.pattern.permute.xlu1 %v703_v13  ;;  %332 = vst.msk [vmem:[#allocation3] sm:$0xff] %vm330_vm1, %v704_v14 }
  0x11   : > { %s755_s21 = sshll.u32 %s287_s20, 3  ;;  %655 = vset.pattern.permute.xlu2 %v703_v13  ;;  %334 = vst.msk [vmem:[#allocation4] sm:$0xff] %vm333_vm0, %v704_v14 }
  0x12   : > { %s519_s24 = scalar_lea.vmem %s801_s1, %s755_s21  ;;  %s289_s27 = scalar_lea.vmem %s800_s0, %s755_s21  ;;  %vm365_vm2 = vcmp.lt.s32.totalorder %v362_v8, 8 }
  0x13   : > { %v604_v0 = vld [vmem:[%s519_s24 + $0x20] sm:$0xff]  ;;  %s525_s30 = scalar_lea.vmem %s802_s2, %s755_s21  ;;  %s324_s6 = scalar_lea.vmem %s803_s3, %s755_s21 }
  0x14   : > { %v336_v1 = vld [vmem:[%s289_s27] sm:$0xff]  ;;  %v340_v2 = vpack.c.bf16 %v604_v0, %v604_v0 }
  0x15   : > { %v337_v4 = vmul.f32 0.25, %v336_v1  ;;  %v606_v19 = vld [vmem:[%s525_s30 + $0x40] sm:$0xff] }
  0x16   : > { %v346_v3 = vsel %vm333_vm0, %v340_v2, 0  ;;  %v367_v15 = vld [vmem:[#allocation2] sm:$0xff]  ;;  %v401_v20 = vpack.c.bf16 %v606_v19, %v606_v19 }
  0x17   : > { %355 = vmatpush.bf16.xpose.msra.mxu0 %v346_v3  ;;  %v338_v5 = vpack.c.bf16 %v337_v4, %v337_v4  ;;  %v384_v30 = vld [vmem:[#allocation3] sm:$0xff] }
  0x18   : > { %v407_v21 = vsel %vm405_vm4, %v401_v20, 0  ;;  %v392_v38 = vld [vmem:[#allocation4] sm:$0xff] }
  0x19   : > { %416 = vmatpush.bf16.msra.mxu1 %v407_v21 }
  0x1e   : > { %605 = vmatmul.msk.bf16.vlgmr.msra.gmra.mxu0 %vm333_vm0, %v338_v5 }
  0x9b   : > { %v357_v9 = vpop.f32.mrf.mxu0 }
  0x9c   : > { %v366_v10 = vsel %vm365_vm2, %v357_v9, -1e+30 }
  0x9d   : > { %v369_v11 = vsel %vm368_vm3, %v366_v10, -inf }
  0x9e   : > { %370 = vmax.xlane.f32.xlu0 %v369_v11 }
  0xa3   : > { %v359_v12 = vpop.f32.mrf.mxu0 }
 0x111   : > { %v371_v16 = vpop.xlane.xlu0 %370 }
 0x112   : > { %v372_v17 = vmax.f32 %v367_v15, %v371_v16 }
 0x114   : > { %v373_v18 = vsub.f32 %v367_v15, %v372_v17  ;;  %424 = vst.msk [vmem:[#allocation2] sm:$0xff] %vm330_vm1, %v372_v17  ;;  %378 = vperm.xlu0 %653, %v372_v17  }
 0x116   : > { %v374_v28 = vmul.f32 1.442695, %v373_v18 }
 0x186   : > { %v379_v22 = vpop.permute.xlu0 %378 }
 0x187   : > { %v381_v23 = vsub.f32 %v366_v10, %v379_v22 }
 0x189   : > { %v382_v24 = vmul.f32 1.442695, %v381_v23 }
 0x18b   : > { %656 = vpow2.f32 %v382_v24 }
 0x18c   : > { %658 = vpow2.f32 %v374_v28 }
 0x191   : > { %v657_v25 = vpop.eup %656 }
 0x192   : > { %v386_v26 = vsel %vm368_vm3, %v657_v25, 0.0  ;;  %v399_v27 = vpack.c.bf16 %v657_v25, %v657_v25  ;;  %v659_v29 = vpop.eup %658 }
 0x193   : > { %387 = vadd.xlane.f32.xlu1 %v386_v26  ;;  %v385_v31 = vmul.f32 %v659_v29, %v384_v30 }
 0x194   : > { %607 = vmatmul.msk.bf16.vlgmr.msra.gmra.mxu1 %vm368_vm3, %v399_v27 }
 0x1ac   : > { %395 = vperm.xlu1 %654, %v659_v29  }
 0x206   : > { %v388_v32 = vpop.xlane.xlu1 %387 }
 0x207   : > { %v389_v33 = vadd.f32 %v388_v32, %v385_v31 }
 0x209   : > { %391 = vst.msk [vmem:[#allocation3] sm:$0xff] %vm330_vm1, %v389_v33 }
 0x210   : > { %v429_v34 = vld [vmem:[#allocation3] sm:$0xff] }
 0x211   : > { %v418_v35 = vpop.f32.mrf.mxu1  ;;  %660 = vrcp.f32 %v429_v34 }
 0x217   : > { %v661_v36 = vpop.eup %660 }
 0x218   : > { %433 = vperm.xlu2 %655, %v661_v36  }
 0x219   : > { %v420_v37 = vpop.f32.mrf.mxu1 }
 0x21e   : > { %v396_v39 = vpop.permute.xlu1 %395 }
 0x21f   : > { %v398_v40 = vmul.f32 %v396_v39, %v392_v38 }
 0x221   : > { %v422_v41 = vadd.f32 %v418_v35, %v398_v40 }
 0x223   : > { %423 = vst.msk [vmem:[#allocation4] sm:$0xff] %vm333_vm0, %v422_v41 }
 0x22a   : > { %v428_v42 = vld [vmem:[#allocation4] sm:$0xff] }
 0x272   : > { %v434_v43 = vpop.permute.xlu2 %433 }
 0x273   : > { %v436_v44 = vmul.f32 %v434_v43, %v428_v42 }
 0x275   : > { %437 = vst.msk [vmem:[%s324_s6] sm:$0xff] %vm333_vm0, %v436_v44 }
 0x276 PF: > { %s13_s16 = sadd.s32 1, %s700_s16   ;;  %s804_s12 = smov %s692_s14 }
 0x277   : > { %p10_p7 = scmp.ge.s32.totalorder %s13_s16, 6   ;;  %s805_s13 = smov %s696_s15 }
 0x278   : > { %s806_s14 = smov %s809_s17  ;;  %s807_s15 = smov %s813_s18 }
 0x279   :  { %12 = sbr.rel (!%p10_p7) target bundleno = 3 (0x3), region = 76 }

// kernel: transformer_forward.49
= control target key start
LH: loop header
LB: loop body
LE: loop exit
PB: predicated region body
PF: predicated region fallthrough
CT: control target
= control target key end

     0   :  { %s146_s0 = inlined_call_operand.vmem [shape: f32[16,32], index: 0, kind: input, shape index: {}]   ;;  %s147_s1 = inlined_call_operand.vmem [shape: f32[32,64], index: 1, kind: input, shape index: {}]   ;;  %s148_s2 = inlined_call_operand.vmem [shape: f32[1,64], index: 2, kind: input, shape index: {}]   ;;  %s149_s3 = inlined_call_operand.hbm [shape: f32[16,64], index: 3, kind: output, shape index: {}]  }
   0x1   :  { %v21_v0 = vld [vmem:[%s147_s1 + $0x10] sm:$0xff]  ;;  %v22_v1 = vld [vmem:[%s147_s1 + $0x18] sm:$0xff]  ;;  %v19_v2 = vld [vmem:[%s147_s1] sm:$0xff] }
   0x2   :  { %v24_v3 = vpack.c.bf16 %v22_v1, %v21_v0  ;;  %v20_v4 = vld [vmem:[%s147_s1 + $0x8] sm:$0xff] }
   0x3   :  { %8 = vsyncpa [#allocation3], 0  ;;  %v23_v5 = vpack.c.bf16 %v20_v4, %v19_v2  ;;  %v16_v6 = vld [vmem:[%s146_s0] sm:$0xff]  ;;  %v17_v7 = vld [vmem:[%s146_s0 + $0x8] sm:$0xff]  ;;  %vm29_vm0 = vcmask 261120   ;;  %vm47_vm1 = vcmask 523264  }
   0x4   :  { %39 = vmatpush.bf16.msra.mxu0 %v24_v3  ;;  %v18_v8 = vpack.c.bf16 %v17_v7, %v16_v6  ;;  %v72_v9 = vld [vmem:[%s148_s2] ss:$0 sm:$0xff]  ;;  %s99_s1 = smov [#allocation2]   ;;  %s56_s29 = sshll.u32 %s149_s3, 4  ;;  %s57_s29 = int_to_ptr.hbm [resolvable:$true] %s56_s29 }
   0x5   :  { %s54_s26 = sshll.u32 %s99_s1, 4  ;;  %s100_s0 = smov 128   ;;  %s55_s26 = int_to_ptr.vmem [resolvable:$true] %s54_s26 }
   0x6   :  { %s101_s30 = smov 8  }
   0x8   :  { %40 = vmatpush.bf16.msra.mxu0 %v23_v5 }
   0xb   :  { %68 = vmatmul.msk.bf16.vlgmr.msra.gmra.mxu0 %vm29_vm0, %v18_v8 }
  0x88   :  { %v42_v10 = vpop.f32.mrf.mxu0 }
  0x89   :  { %v43_v11 = vadd.f32 %v72_v9, %v42_v10 }
  0x8b   :  { %48 = vst.msk [vmem:[#allocation2] sm:$0xff] %vm47_vm1, %v43_v11 }
  0x90   :  { %v44_v12 = vpop.f32.mrf.mxu0 }
  0x91   :  { %v45_v13 = vadd.f32 %v72_v9, %v44_v12 }
  0x93   :  { %49 = vst.msk [vmem:[#allocation2 + $0x8] sm:$0xff] %vm47_vm1, %v45_v13 }
  0x94   :  { %62 = dma.vmem_to_hbm [thread:$0]  %s55_s26, 256, %s57_s29, [#allocation3], %s100_s0, %s100_s0, %s101_s30  }
  0x95   :  { %97 = dma.done.wait [#allocation3], 256  }
  0x96   :  { %98 = vsyncadd [#allocation3], 4294967040 }
  0x97   :  { %67 = vsyncpa [#allocation3], 1 }

// kernel: transformer_forward.38
= control target key start
LH: loop header
LB: loop body
LE: loop exit
PB: predicated region body
PF: predicated region fallthrough
CT: control target
= control target key end

     0   :  { %s718_s12 = smov 0   ;;  %s720_s13 = smov 0   ;;  %s793_s0 = inlined_call_operand.vmem [shape: f32[1,2,2,8,16], index: 0, kind: input, shape index: {}]   ;;  %s794_s1 = inlined_call_operand.vmem [shape: f32[2,2,2,8,16], index: 1, kind: input, shape index: {}, may-alias: {1,2}]   ;;  %s795_s2 = inlined_call_operand.vmem [shape: f32[2,2,2,8,16], index: 2, kind: input, shape index: {}, may-alias: {1,2}]   ;;  %s796_s3 = inlined_call_operand.vmem [shape: f32[2,2,8,16], index: 3, kind: output, shape index: {}]  }
   0x1   :  { %s722_s14 = smov 0   ;;  %s724_s15 = smov 0  }
   0x2   :  { %s726_s16 = smov 0  }
   0x3 LB: > { %s35_s17 = sadd.s32 1, %s685_s14  ;;  %s39_s18 = sadd.s32 1, %s689_s15  ;;  %s693_s16 = sphi %s726_s16, %s13_s16   ;;  %s689_s15 = sphi %s724_s15, %s800_s15   ;;  %s685_s14 = sphi %s722_s14, %s799_s14   ;;  %s681_s13 = sphi %s720_s13, %s798_s13   ;;  %s677_s12 = sphi %s718_s12, %s797_s12  }
   0x4   : > { %p37_p0 = scmp.ge.s32.totalorder %s35_s17, 2  ;;  %p589_p1 = scmp.ge.s32.totalorder %s693_s16, 1 }
   0x5   : > { %p218_p2 = scmp.lt.s32.totalorder %s693_s16, 5 }
   0x6   : > { %s802_s17 = smov (%p37_p0, %s35_s17), 0  ;;  %s804_s18 = smov (!%p37_p0, %s39_s18), %s689_s15 }
   0x7   : > { %p219_p3 = pnand %p589_p1, %p218_p2  ;;  %p41_p4 = scmp.ge.s32.totalorder %s804_s18, 2 }
   0x8   : > { %p277_p5 = scmp.lt.s32.totalorder (!%p219_p3), %s681_s13, 1  ;;  %p279_p6 = scmp.lt.s32.totalorder (!%p219_p3), %s677_s12, 1 }
   0x9   : > { %s806_s18 = smov (%p41_p4, %s804_s18), 0  ;;  %222 = sbr.rel (%p219_p3) target bundleno = 630 (0x276), region = 32 }
   0xe   : > { %s808_s13 = smov (!%p277_p5, %s681_s13), 1  ;;  %s810_s12 = smov (!%p279_p6, %s677_s12), 1  ;;  %vm330_vm0 = vcmask 130048   ;;  %vm327_vm1 = vcmask 7168   ;;  %v695_v6 = vmov -1e+30   ;;  %v358_v7 = vlaneseq }
   0xf   : > { %s590_s19 = sshll.u32 %s808_s13, 1  ;;  %328 = vst.msk [vmem:[#allocation2] sm:$0xff] %vm327_vm1, %v695_v6  ;;  %vm365_vm3 = vcmask 64512   ;;  %v696_v13 = vmov 0   ;;  %v697_v14 = vmov 0.0   ;;  %vm402_vm4 = vcmask 1043456  }
  0x10   : > { %s285_s20 = sadd.s32 %s590_s19, %s810_s12  ;;  %v359_v8 = vand.u32 127, %v358_v7  ;;  %646 = vset.pattern.permute.xlu0 %v696_v13  ;;  %647 = vset.pattern.permute.xlu1 %v696_v13  ;;  %329 = vst.msk [vmem:[#allocation3] sm:$0xff] %vm327_vm1, %v697_v14 }
  0x11   : > { %s748_s21 = sshll.u32 %s285_s20, 3  ;;  %648 = vset.pattern.permute.xlu2 %v696_v13  ;;  %331 = vst.msk [vmem:[#allocation4] sm:$0xff] %vm330_vm0, %v697_v14 }
  0x12   : > { %s298_s24 = scalar_lea.vmem %s794_s1, %s748_s21  ;;  %s287_s27 = scalar_lea.vmem %s793_s0, %s748_s21  ;;  %vm362_vm2 = vcmp.lt.s32.totalorder %v359_v8, 8 }
  0x13   : > { %v336_v0 = vld [vmem:[%s298_s24] sm:$0xff]  ;;  %s519_s30 = scalar_lea.vmem %s795_s2, %s748_s21  ;;  %s321_s6 = scalar_lea.vmem %s796_s3, %s748_s21 }
  0x14   : > { %v333_v1 = vld [vmem:[%s287_s27] sm:$0xff]  ;;  %v337_v2 = vpack.c.bf16 %v336_v0, %v336_v0 }
  0x15   : > { %v334_v4 = vmul.f32 0.25, %v333_v1  ;;  %v599_v19 = vld [vmem:[%s519_s30 + $0x20] sm:$0xff] }
  0x16   : > { %v343_v3 = vsel %vm330_vm0, %v337_v2, 0  ;;  %v364_v15 = vld [vmem:[#allocation2] sm:$0xff]  ;;  %v398_v20 = vpack.c.bf16 %v599_v19, %v599_v19 }
  0x17   : > { %352 = vmatpush.bf16.xpose.msra.mxu0 %v343_v3  ;;  %v335_v5 = vpack.c.bf16 %v334_v4, %v334_v4  ;;  %v381_v30 = vld [vmem:[#allocation3] sm:$0xff] }
  0x18   : > { %v404_v21 = vsel %vm402_vm4, %v398_v20, 0  ;;  %v389_v38 = vld [vmem:[#allocation4] sm:$0xff] }
  0x19   : > { %413 = vmatpush.bf16.msra.mxu1 %v404_v21 }
  0x1e   : > { %598 = vmatmul.msk.bf16.vlgmr.msra.gmra.mxu0 %vm330_vm0, %v335_v5 }
  0x9b   : > { %v354_v9 = vpop.f32.mrf.mxu0 }
  0x9c   : > { %v363_v10 = vsel %vm362_vm2, %v354_v9, -1e+30 }
  0x9d   : > { %v366_v11 = vsel %vm365_vm3, %v363_v10, -inf }
  0x9e   : > { %367 = vmax.xlane.f32.xlu0 %v366_v11 }
  0xa3   : > { %v356_v12 = vpop.f32.mrf.mxu0 }
 0x111   : > { %v368_v16 = vpop.xlane.xlu0 %367 }
 0x112   : > { %v369_v17 = vmax.f32 %v364_v15, %v368_v16 }
 0x114   : > { %v370_v18 = vsub.f32 %v364_v15, %v369_v17  ;;  %421 = vst.msk [vmem:[#allocation2] sm:$0xff] %vm327_vm1, %v369_v17  ;;  %375 = vperm.xlu0 %646, %v369_v17  }
 0x116   : > { %v371_v28 = vmul.f32 1.442695, %v370_v18 }
 0x186   : > { %v376_v22 = vpop.permute.xlu0 %375 }
 0x187   : > { %v378_v23 = vsub.f32 %v363_v10, %v376_v22 }
 0x189   : > { %v379_v24 = vmul.f32 1.442695, %v378_v23 }
 0x18b   : > { %649 = vpow2.f32 %v379_v24 }
 0x18c   : > { %651 = vpow2.f32 %v371_v28 }
 0x191   : > { %v650_v25 = vpop.eup %649 }
 0x192   : > { %v383_v26 = vsel %vm365_vm3, %v650_v25, 0.0  ;;  %v396_v27 = vpack.c.bf16 %v650_v25, %v650_v25  ;;  %v652_v29 = vpop.eup %651 }
 0x193   : > { %384 = vadd.xlane.f32.xlu1 %v383_v26  ;;  %v382_v31 = vmul.f32 %v652_v29, %v381_v30 }
 0x194   : > { %600 = vmatmul.msk.bf16.vlgmr.msra.gmra.mxu1 %vm365_vm3, %v396_v27 }
 0x1ac   : > { %392 = vperm.xlu1 %647, %v652_v29  }
 0x206   : > { %v385_v32 = vpop.xlane.xlu1 %384 }
 0x207   : > { %v386_v33 = vadd.f32 %v385_v32, %v382_v31 }
 0x209   : > { %388 = vst.msk [vmem:[#allocation3] sm:$0xff] %vm327_vm1, %v386_v33 }
 0x210   : > { %v426_v34 = vld [vmem:[#allocation3] sm:$0xff] }
 0x211   : > { %v415_v35 = vpop.f32.mrf.mxu1  ;;  %653 = vrcp.f32 %v426_v34 }
 0x217   : > { %v654_v36 = vpop.eup %653 }
 0x218   : > { %430 = vperm.xlu2 %648, %v654_v36  }
 0x219   : > { %v417_v37 = vpop.f32.mrf.mxu1 }
 0x21e   : > { %v393_v39 = vpop.permute.xlu1 %392 }
 0x21f   : > { %v395_v40 = vmul.f32 %v393_v39, %v389_v38 }
 0x221   : > { %v419_v41 = vadd.f32 %v415_v35, %v395_v40 }
 0x223   : > { %420 = vst.msk [vmem:[#allocation4] sm:$0xff] %vm330_vm0, %v419_v41 }
 0x22a   : > { %v425_v42 = vld [vmem:[#allocation4] sm:$0xff] }
 0x272   : > { %v431_v43 = vpop.permute.xlu2 %430 }
 0x273   : > { %v433_v44 = vmul.f32 %v431_v43, %v425_v42 }
 0x275   : > { %434 = vst.msk [vmem:[%s321_s6] sm:$0xff] %vm330_vm0, %v433_v44 }
 0x276 PF: > { %s13_s16 = sadd.s32 1, %s693_s16   ;;  %s797_s12 = smov %s685_s14 }
 0x277   : > { %p10_p7 = scmp.ge.s32.totalorder %s13_s16, 6   ;;  %s798_s13 = smov %s689_s15 }
 0x278   : > { %s799_s14 = smov %s802_s17  ;;  %s800_s15 = smov %s806_s18 }
 0x279   :  { %12 = sbr.rel (!%p10_p7) target bundleno = 3 (0x3), region = 76 }

</bundles_post_ra>
